<compile_context>
chip_gen: v7x
topology: tpu7x:2x2x1
jax: 0.10.0
libtpu: 0.0.40
codegen_flags: <defaults>
</compile_context>

<pallas_src>
import jax
import jax.numpy as jnp
from jax.experimental import pallas as pl
from jax.experimental.pallas import tpu as pltpu

LANE = 128
_LEFT = 16                         # mid-scratch interior column offset (bf16 tile aligned)
MATMUL_DTYPE = jnp.bfloat16        # MXU input dtype (f32 accumulate)


def _round_up(x, m):
    return (x + m - 1) // m * m


def _choose_band(h, max_band=32):
    """Largest divisor of h that is <= min(max_band, h//2) (so we get >=2 bands when possible)."""
    cap = max(1, min(max_band, h // 2)) if h > 1 else 1
    band = 1
    for d in range(1, cap + 1):
        if h % d == 0:
            band = d
    return band


def _derive_vmem_limit(per_step_bytes):
    """Generation-aware scoped-VMEM limit derived from the actual working set."""
    need = int(per_step_bytes * 1.5) + (2 << 20)        # headroom for compiler scratch
    cap = 64 * 1024 * 1024                              # conservative (v7x per-TC)
    try:
        info = pltpu.get_tpu_info()
        cap = int(getattr(info, "vmem_capacity_bytes", cap) or cap)
    except Exception:
        pass
    return int(max(16 << 20, min(need, cap - (4 << 20))))


def _double_conv_kernel(xc_ref, w1_ref, b1_ref, w2_ref, b2_ref, o_ref, mid_ref):
    """One grid step = one (batch, H-band) tile; both convs fused, y1 stays in VMEM.

    xc_ref : (1, band+2, W, K1p)  bf16  wrapper-im2col'd input rows (band + 1-row halo)
    w1_ref : (K1p, Cmid_p)        bf16  compact im2col conv1 weights
    b1_ref : (1, Cmid_p)          f32
    w2_ref : (9, Cmid_p, Cout_p)  bf16  per-tap conv2 weights
    b2_ref : (1, Cout_p)          f32
    o_ref  : (1, band, W, Cout)   lane-compact output tile (real Cout, no padding)
    mid_ref: (band+2, WP, Cmid_p) bf16  scratch; interior columns [_LEFT, _LEFT+W)
    """
    band = o_ref.shape[1]
    w = o_ref.shape[2]
    cout = o_ref.shape[3]
    rows = mid_ref.shape[0]            # band + 2
    wp = mid_ref.shape[1]
    cmid_p = mid_ref.shape[2]
    cout_p = w2_ref.shape[2]

    # ---- Stage 1: conv1 + bias + ReLU as ONE MXU dot (K already compacted in wrapper).
    xc = xc_ref[0]                                                  # (rows, W, K1p)
    y1 = jnp.dot(xc.reshape(rows * w, xc.shape[-1]), w1_ref[...],
                 preferred_element_type=jnp.float32)
    y1 = jnp.maximum(y1 + b1_ref[...], 0.0)                         # f32 epilogue
    # Tile-aligned scatter of the whole band (+halo rows) into the bf16 scratch interior.
    mid_ref[:, _LEFT:_LEFT + w, :] = y1.reshape(rows, w, cmid_p).astype(mid_ref.dtype)

    # ---- Zero ONLY the conv2 halo (2 thin columns; interior is fully overwritten).
    zcol = jnp.zeros((rows, 1, cmid_p), mid_ref.dtype)
    mid_ref[:, _LEFT - 1:_LEFT, :] = zcol
    mid_ref[:, _LEFT + w:_LEFT + w + 1, :] = zcol

    # Row halo: only where the band touches the image boundary (the boundary slab rows
    # were computed from the wrapper's fake zero rows -> relu(b1); overwrite with zeros).
    hb = pl.program_id(1)

    @pl.when(hb == 0)
    def _():
        mid_ref[0:1, :, :] = jnp.zeros((1, wp, cmid_p), mid_ref.dtype)

    @pl.when(hb == pl.num_programs(1) - 1)
    def _():
        mid_ref[rows - 1:rows, :, :] = jnp.zeros((1, wp, cmid_p), mid_ref.dtype)

    # ---- Stage 2: nine accumulating per-tap MXU dots (no im2col patch slab).
    acc = jnp.zeros((band * w, cout_p), jnp.float32)
    for t in range(9):
        dy, dx = divmod(t, 3)
        c0 = _LEFT - 1 + dx
        tap = mid_ref[dy:dy + band, c0:c0 + w, :].reshape(band * w, cmid_p)
        acc = acc + jnp.dot(tap, w2_ref[t], preferred_element_type=jnp.float32)
    acc = jnp.maximum(acc + b2_ref[...], 0.0)                       # bias + ReLU, f32

    # Lane-compact store (real Cout) -> no padded HBM write-back, no wrapper slice pass.
    o_ref[...] = acc[:, :cout].reshape(1, band, w, cout).astype(o_ref.dtype)


def double_conv_nhwc(x_nhwc, w1, b1, w2, b2):
    """Fused DoubleConv in NHWC. w1: (3,3,Cin,Cmid), w2: (3,3,Cmid,Cout) (HWIO)."""
    N, H, W, Cin = x_nhwc.shape
    Cmid = w1.shape[-1]
    Cout = w2.shape[-1]

    K1 = 9 * Cin
    K1p = _round_up(K1, LANE)               # compact K: taps x real channels, THEN pad
    Cmid_p = _round_up(Cmid, LANE)
    Cout_p = _round_up(Cout, LANE)

    band = _choose_band(H)
    NB = H // band
    rows = band + 2
    WP = _round_up(_LEFT + W + 1, 16)       # sublane-padded scratch width (bf16 tiles)

    # ---- Wrapper-side compact im2col for conv1 (x is small; this is ~free here). ----
    xp = jnp.pad(x_nhwc, ((0, 0), (1, 1), (1, 1), (0, 0)))
    cols = [xp[:, dy:dy + H, dx:dx + W, :] for dy in range(3) for dx in range(3)]
    xc = jnp.concatenate(cols, axis=-1)                              # (N, H, W, 9*Cin)
    xc = jnp.pad(xc, ((0, 0), (0, 0), (0, 0), (0, K1p - K1))).astype(MATMUL_DTYPE)
    # One fake zero row top/bottom so every H-band slab is a uniform (band+2)-row block.
    xc = jnp.pad(xc, ((0, 0), (1, 1), (0, 0), (0, 0)))               # (N, H+2, W, K1p)
    # Overlapping H-band slabs (2-row overlap), batch+band folded into one leading axis.
    bands = jnp.stack([xc[:, hb * band: hb * band + rows] for hb in range(NB)], axis=1)
    xc_bands = bands.reshape(N * NB, rows, W, K1p)

    # ---- Weight / bias packing. ----
    w1_p = jnp.pad(w1.reshape(K1, Cmid),
                   ((0, K1p - K1), (0, Cmid_p - Cmid))).astype(MATMUL_DTYPE)
    b1_p = jnp.pad(b1.astype(jnp.float32), (0, Cmid_p - Cmid)).reshape(1, Cmid_p)
    w2_p = jnp.pad(w2, ((0, 0), (0, 0), (0, Cmid_p - Cmid), (0, Cout_p - Cout)))
    w2_p = w2_p.reshape(9, Cmid_p, Cout_p).astype(MATMUL_DTYPE)
    b2_p = jnp.pad(b2.astype(jnp.float32), (0, Cout_p - Cout)).reshape(1, Cout_p)

    # ---- Derived (not hardcoded) scoped-VMEM limit. ----
    bsz = jnp.dtype(MATMUL_DTYPE).itemsize
    per_step = (
        2 * rows * W * K1p * bsz                         # double-buffered input band
        + 2 * (K1p * Cmid_p + 9 * Cmid_p * Cout_p) * bsz  # resident weights
        + 2 * (Cmid_p + Cout_p) * 4                      # biases
        + 2 * band * W * Cout * x_nhwc.dtype.itemsize    # double-buffered output block
        + rows * WP * Cmid_p * bsz                       # bf16 mid scratch
    )
    vmem_limit = _derive_vmem_limit(per_step)

    out = pl.pallas_call(
        _double_conv_kernel,
        out_shape=jax.ShapeDtypeStruct((N, H, W, Cout), x_nhwc.dtype),
        grid_spec=pltpu.PrefetchScalarGridSpec(
            num_scalar_prefetch=0,
            grid=(N, NB),
            in_specs=[
                pl.BlockSpec((1, rows, W, K1p), lambda n, hb: (n * NB + hb, 0, 0, 0)),
                pl.BlockSpec((K1p, Cmid_p), lambda n, hb: (0, 0)),
                pl.BlockSpec((1, Cmid_p), lambda n, hb: (0, 0)),
                pl.BlockSpec((9, Cmid_p, Cout_p), lambda n, hb: (0, 0, 0)),
                pl.BlockSpec((1, Cout_p), lambda n, hb: (0, 0)),
            ],
            out_specs=pl.BlockSpec((1, band, W, Cout), lambda n, hb: (n, hb, 0, 0)),
            scratch_shapes=[pltpu.VMEM((rows, WP, Cmid_p), MATMUL_DTYPE)],
        ),
        compiler_params=pltpu.CompilerParams(
            dimension_semantics=("parallel", "parallel"),
            vmem_limit_bytes=vmem_limit,
        ),
    )(xc_bands, w1_p, b1_p, w2_p, b2_p)
    return out


def double_conv(x_nchw, w1, b1, w2, b2):
    """PyTorch-facing wrapper: NCHW in/out (matches DoubleConv.forward semantics)."""
    x = jnp.transpose(x_nchw, (0, 2, 3, 1))       # NCHW -> NHWC
    y = double_conv_nhwc(x, w1, b1, w2, b2)
    return jnp.transpose(y, (0, 3, 1, 2))         # NHWC -> NCHW


# ----------------------------- pure-JAX reference ---------------------------------------
def _ref_conv3x3_relu(x_nhwc, w_hwio, bias):
    y = jax.lax.conv_general_dilated(
        x_nhwc, w_hwio, window_strides=(1, 1), padding="SAME",
        dimension_numbers=("NHWC", "HWIO", "NHWC"),
        precision=jax.lax.Precision.HIGHEST)
    return jnp.maximum(y + bias[None, None, None, :], 0.0)


def _ref_double_conv(x_nchw, w1, b1, w2, b2):
    x = jnp.transpose(x_nchw, (0, 2, 3, 1))
    y = _ref_conv3x3_relu(x, w1, b1)
    y = _ref_conv3x3_relu(y, w2, b2)
    return jnp.transpose(y, (0, 3, 1, 2))


if __name__ == "__main__":
    # Small shapes consistent with the module: batch=2, in_channels=4, out_channels=8, 16x16.
    N, Cin, Cout, H, W = 2, 4, 8, 16, 16

    key = jax.random.PRNGKey(0)
    kx, kw1, kb1, kw2, kb2 = jax.random.split(key, 5)

    x = jax.random.normal(kx, (N, Cin, H, W), dtype=jnp.float32)

    # Deterministic synthetic parameters (Conv2d-like fan-in scaling), HWIO layout.
    s1 = 1.0 / (Cin * 9) ** 0.5
    w1 = jax.random.uniform(kw1, (3, 3, Cin, Cout), jnp.float32, -s1, s1)
    b1 = jax.random.uniform(kb1, (Cout,), jnp.float32, -s1, s1)
    s2 = 1.0 / (Cout * 9) ** 0.5
    w2 = jax.random.uniform(kw2, (3, 3, Cout, Cout), jnp.float32, -s2, s2)
    b2 = jax.random.uniform(kb2, (Cout,), jnp.float32, -s2, s2)

    out = jax.jit(double_conv)(x, w1, b1, w2, b2)
    out = jax.block_until_ready(out)

    ref = _ref_double_conv(x, w1, b1, w2, b2)
    assert out.shape == (N, Cout, H, W), out.shape
    # bf16 MXU inputs + bf16 intermediate storage (f32 accumulate) vs f32 XLA reference.
    err = float(jnp.max(jnp.abs(out - ref)))
    assert jnp.allclose(out, ref, atol=2.5e-2, rtol=2.5e-2), \
        f"mismatch vs ref, max_abs_err={err}"

    print("KERNEL_OK")
</pallas_src>

<mosaic_0001>
module attributes {stable_mosaic.version = 11 : i64} {
  func.func @_double_conv_kernel(%arg0: i32, %arg1: i32, %arg2: memref<1x10x16x128xbf16, #tpu.memory_space<vmem>>, %arg3: memref<128x128xbf16, #tpu.memory_space<vmem>>, %arg4: memref<1x128xf32, #tpu.memory_space<vmem>>, %arg5: memref<9x128x128xbf16, #tpu.memory_space<vmem>>, %arg6: memref<1x128xf32, #tpu.memory_space<vmem>>, %arg7: memref<1x8x16x8xf32, #tpu.memory_space<vmem>>, %arg8: memref<10x48x128xbf16, #tpu.memory_space<vmem>>) attributes {dimension_semantics = [#tpu.dimension_semantics<parallel>, #tpu.dimension_semantics<parallel>], iteration_bounds = array<i64: 2, 2>, scalar_prefetch = 0 : i64, scratch_operands = 1 : i64, tpu.core_type = #tpu.core_type<tc>, window_params = [{transform_indices = @transform_0, window_bounds = array<i64: 1, 10, 16, 128>}, {pipeline_mode = #tpu.pipeline_mode<synchronous>, transform_indices = @transform_1, window_bounds = array<i64: 128, 128>}, {pipeline_mode = #tpu.pipeline_mode<synchronous>, transform_indices = @transform_2, window_bounds = array<i64: 1, 128>}, {pipeline_mode = #tpu.pipeline_mode<synchronous>, transform_indices = @transform_3, window_bounds = array<i64: 9, 128, 128>}, {pipeline_mode = #tpu.pipeline_mode<synchronous>, transform_indices = @transform_4, window_bounds = array<i64: 1, 128>}, {transform_indices = @transform_5, window_bounds = array<i64: 1, 8, 16, 8>}]} {
    %c0 = arith.constant 0 : index
    %c0_0 = arith.constant 0 : index
    %c0_1 = arith.constant 0 : index
    %c0_2 = arith.constant 0 : index
    %0 = vector.load %arg2[%c0, %c0_0, %c0_1, %c0_2] : memref<1x10x16x128xbf16, #tpu.memory_space<vmem>>, vector<1x10x16x128xbf16>
    %1 = vector.shape_cast %0 : vector<1x10x16x128xbf16> to vector<10x16x128xbf16>
    %2 = vector.shape_cast %1 : vector<10x16x128xbf16> to vector<160x128xbf16>
    %c0_3 = arith.constant 0 : index
    %c0_4 = arith.constant 0 : index
    %3 = vector.load %arg3[%c0_3, %c0_4] : memref<128x128xbf16, #tpu.memory_space<vmem>>, vector<128x128xbf16>
    %cst = arith.constant dense<0.000000e+00> : vector<160x128xf32>
    %4 = tpu.matmul %2, %3, %cst {dimension_numbers = #tpu.dot_dimension_numbers<[1], [0], [0], [1], [0, 0, 1, 1], [], []>} : vector<160x128xbf16>, vector<128x128xbf16>, vector<160x128xf32> -> vector<160x128xf32>
    %c0_5 = arith.constant 0 : index
    %c0_6 = arith.constant 0 : index
    %5 = vector.load %arg4[%c0_5, %c0_6] : memref<1x128xf32, #tpu.memory_space<vmem>>, vector<1x128xf32>
    %6 = vector.broadcast %5 : vector<1x128xf32> to vector<160x128xf32>
    %7 = arith.addf %4, %6 : vector<160x128xf32>
    %cst_7 = arith.constant 0.000000e+00 : f32
    %8 = vector.broadcast %cst_7 : f32 to vector<160x128xf32>
    %9 = arith.maximumf %7, %8 : vector<160x128xf32>
    %10 = vector.shape_cast %9 : vector<160x128xf32> to vector<10x16x128xf32>
    %11 = arith.truncf %10 : vector<10x16x128xf32> to vector<10x16x128xbf16>
    %c0_8 = arith.constant 0 : index
    %c16 = arith.constant 16 : index
    %c0_9 = arith.constant 0 : index
    %12 = vector.load %arg8[%c0_8, %c16, %c0_9] : memref<10x48x128xbf16, #tpu.memory_space<vmem>>, vector<10x16x128xbf16>
    tpu.vector_store %arg8[%c0_8, %c16, %c0_9], %11 {strides = array<i32>} : memref<10x48x128xbf16, #tpu.memory_space<vmem>>, vector<10x16x128xbf16>,
    %cst_10 = arith.constant 0.000000e+00 : bf16
    %13 = vector.broadcast %cst_10 : bf16 to vector<10x1x128xbf16>
    %c0_11 = arith.constant 0 : index
    %c15 = arith.constant 15 : index
    %c0_12 = arith.constant 0 : index
    %14 = vector.load %arg8[%c0_11, %c15, %c0_12] : memref<10x48x128xbf16, #tpu.memory_space<vmem>>, vector<10x1x128xbf16>
    tpu.vector_store %arg8[%c0_11, %c15, %c0_12], %13 {strides = array<i32>} : memref<10x48x128xbf16, #tpu.memory_space<vmem>>, vector<10x1x128xbf16>,
    %c0_13 = arith.constant 0 : index
    %c32 = arith.constant 32 : index
    %c0_14 = arith.constant 0 : index
    %15 = vector.load %arg8[%c0_13, %c32, %c0_14] : memref<10x48x128xbf16, #tpu.memory_space<vmem>>, vector<10x1x128xbf16>
    tpu.vector_store %arg8[%c0_13, %c32, %c0_14], %13 {strides = array<i32>} : memref<10x48x128xbf16, #tpu.memory_space<vmem>>, vector<10x1x128xbf16>,
    %c0_i32 = arith.constant 0 : i32
    %16 = arith.cmpi eq, %arg1, %c0_i32 : i32
    %17 = arith.extui %16 : i1 to i32
    %c0_i32_15 = arith.constant 0 : i32
    %18 = arith.cmpi ne, %17, %c0_i32_15 : i32
    scf.if %18 {
      %cst_79 = arith.constant 0.000000e+00 : bf16
      %85 = vector.broadcast %cst_79 : bf16 to vector<1x48x128xbf16>
      %c0_80 = arith.constant 0 : index
      %c0_81 = arith.constant 0 : index
      %c0_82 = arith.constant 0 : index
      %86 = vector.load %arg8[%c0_80, %c0_81, %c0_82] : memref<10x48x128xbf16, #tpu.memory_space<vmem>>, vector<1x48x128xbf16>
      tpu.vector_store %arg8[%c0_80, %c0_81, %c0_82], %85 {strides = array<i32>} : memref<10x48x128xbf16, #tpu.memory_space<vmem>>, vector<1x48x128xbf16>,
    } else {
    }
    %c1_i32 = arith.constant 1 : i32
    %19 = arith.cmpi eq, %arg1, %c1_i32 : i32
    %20 = arith.extui %19 : i1 to i32
    %c0_i32_16 = arith.constant 0 : i32
    %21 = arith.cmpi ne, %20, %c0_i32_16 : i32
    scf.if %21 {
      %cst_79 = arith.constant 0.000000e+00 : bf16
      %85 = vector.broadcast %cst_79 : bf16 to vector<1x48x128xbf16>
      %c9 = arith.constant 9 : index
      %c0_80 = arith.constant 0 : index
      %c0_81 = arith.constant 0 : index
      %86 = vector.load %arg8[%c9, %c0_80, %c0_81] : memref<10x48x128xbf16, #tpu.memory_space<vmem>>, vector<1x48x128xbf16>
      tpu.vector_store %arg8[%c9, %c0_80, %c0_81], %85 {strides = array<i32>} : memref<10x48x128xbf16, #tpu.memory_space<vmem>>, vector<1x48x128xbf16>,
    } else {
    }
    %cst_17 = arith.constant 0.000000e+00 : f32
    %22 = vector.broadcast %cst_17 : f32 to vector<128x128xf32>
    %c0_18 = arith.constant 0 : index
    %c15_19 = arith.constant 15 : index
    %c0_20 = arith.constant 0 : index
    %23 = vector.load %arg8[%c0_18, %c15_19, %c0_20] : memref<10x48x128xbf16, #tpu.memory_space<vmem>>, vector<8x16x128xbf16>
    %24 = vector.shape_cast %23 : vector<8x16x128xbf16> to vector<128x128xbf16>
    %c0_21 = arith.constant 0 : index
    %c0_22 = arith.constant 0 : index
    %c0_23 = arith.constant 0 : index
    %25 = vector.load %arg5[%c0_21, %c0_22, %c0_23] : memref<9x128x128xbf16, #tpu.memory_space<vmem>>, vector<1x128x128xbf16>
    %26 = vector.shape_cast %25 : vector<1x128x128xbf16> to vector<128x128xbf16>
    %cst_24 = arith.constant dense<0.000000e+00> : vector<128x128xf32>
    %27 = tpu.matmul %24, %26, %cst_24 {dimension_numbers = #tpu.dot_dimension_numbers<[1], [0], [0], [1], [0, 0, 1, 1], [], []>} : vector<128x128xbf16>, vector<128x128xbf16>, vector<128x128xf32> -> vector<128x128xf32>
    %28 = arith.addf %22, %27 : vector<128x128xf32>
    %c0_25 = arith.constant 0 : index
    %c16_26 = arith.constant 16 : index
    %c0_27 = arith.constant 0 : index
    %29 = vector.load %arg8[%c0_25, %c16_26, %c0_27] : memref<10x48x128xbf16, #tpu.memory_space<vmem>>, vector<8x16x128xbf16>
    %30 = vector.shape_cast %29 : vector<8x16x128xbf16> to vector<128x128xbf16>
    %c1 = arith.constant 1 : index
    %c0_28 = arith.constant 0 : index
    %c0_29 = arith.constant 0 : index
    %31 = vector.load %arg5[%c1, %c0_28, %c0_29] : memref<9x128x128xbf16, #tpu.memory_space<vmem>>, vector<1x128x128xbf16>
    %32 = vector.shape_cast %31 : vector<1x128x128xbf16> to vector<128x128xbf16>
    %cst_30 = arith.constant dense<0.000000e+00> : vector<128x128xf32>
    %33 = tpu.matmul %30, %32, %cst_30 {dimension_numbers = #tpu.dot_dimension_numbers<[1], [0], [0], [1], [0, 0, 1, 1], [], []>} : vector<128x128xbf16>, vector<128x128xbf16>, vector<128x128xf32> -> vector<128x128xf32>
    %34 = arith.addf %28, %33 : vector<128x128xf32>
    %c0_31 = arith.constant 0 : index
    %c17 = arith.constant 17 : index
    %c0_32 = arith.constant 0 : index
    %35 = vector.load %arg8[%c0_31, %c17, %c0_32] : memref<10x48x128xbf16, #tpu.memory_space<vmem>>, vector<8x16x128xbf16>
    %36 = vector.shape_cast %35 : vector<8x16x128xbf16> to vector<128x128xbf16>
    %c2 = arith.constant 2 : index
    %c0_33 = arith.constant 0 : index
    %c0_34 = arith.constant 0 : index
    %37 = vector.load %arg5[%c2, %c0_33, %c0_34] : memref<9x128x128xbf16, #tpu.memory_space<vmem>>, vector<1x128x128xbf16>
    %38 = vector.shape_cast %37 : vector<1x128x128xbf16> to vector<128x128xbf16>
    %cst_35 = arith.constant dense<0.000000e+00> : vector<128x128xf32>
    %39 = tpu.matmul %36, %38, %cst_35 {dimension_numbers = #tpu.dot_dimension_numbers<[1], [0], [0], [1], [0, 0, 1, 1], [], []>} : vector<128x128xbf16>, vector<128x128xbf16>, vector<128x128xf32> -> vector<128x128xf32>
    %40 = arith.addf %34, %39 : vector<128x128xf32>
    %c1_36 = arith.constant 1 : index
    %c15_37 = arith.constant 15 : index
    %c0_38 = arith.constant 0 : index
    %41 = vector.load %arg8[%c1_36, %c15_37, %c0_38] : memref<10x48x128xbf16, #tpu.memory_space<vmem>>, vector<8x16x128xbf16>
    %42 = vector.shape_cast %41 : vector<8x16x128xbf16> to vector<128x128xbf16>
    %c3 = arith.constant 3 : index
    %c0_39 = arith.constant 0 : index
    %c0_40 = arith.constant 0 : index
    %43 = vector.load %arg5[%c3, %c0_39, %c0_40] : memref<9x128x128xbf16, #tpu.memory_space<vmem>>, vector<1x128x128xbf16>
    %44 = vector.shape_cast %43 : vector<1x128x128xbf16> to vector<128x128xbf16>
    %cst_41 = arith.constant dense<0.000000e+00> : vector<128x128xf32>
    %45 = tpu.matmul %42, %44, %cst_41 {dimension_numbers = #tpu.dot_dimension_numbers<[1], [0], [0], [1], [0, 0, 1, 1], [], []>} : vector<128x128xbf16>, vector<128x128xbf16>, vector<128x128xf32> -> vector<128x128xf32>
    %46 = arith.addf %40, %45 : vector<128x128xf32>
    %c1_42 = arith.constant 1 : index
    %c16_43 = arith.constant 16 : index
    %c0_44 = arith.constant 0 : index
    %47 = vector.load %arg8[%c1_42, %c16_43, %c0_44] : memref<10x48x128xbf16, #tpu.memory_space<vmem>>, vector<8x16x128xbf16>
    %48 = vector.shape_cast %47 : vector<8x16x128xbf16> to vector<128x128xbf16>
    %c4 = arith.constant 4 : index
    %c0_45 = arith.constant 0 : index
    %c0_46 = arith.constant 0 : index
    %49 = vector.load %arg5[%c4, %c0_45, %c0_46] : memref<9x128x128xbf16, #tpu.memory_space<vmem>>, vector<1x128x128xbf16>
    %50 = vector.shape_cast %49 : vector<1x128x128xbf16> to vector<128x128xbf16>
    %cst_47 = arith.constant dense<0.000000e+00> : vector<128x128xf32>
    %51 = tpu.matmul %48, %50, %cst_47 {dimension_numbers = #tpu.dot_dimension_numbers<[1], [0], [0], [1], [0, 0, 1, 1], [], []>} : vector<128x128xbf16>, vector<128x128xbf16>, vector<128x128xf32> -> vector<128x128xf32>
    %52 = arith.addf %46, %51 : vector<128x128xf32>
    %c1_48 = arith.constant 1 : index
    %c17_49 = arith.constant 17 : index
    %c0_50 = arith.constant 0 : index
    %53 = vector.load %arg8[%c1_48, %c17_49, %c0_50] : memref<10x48x128xbf16, #tpu.memory_space<vmem>>, vector<8x16x128xbf16>
    %54 = vector.shape_cast %53 : vector<8x16x128xbf16> to vector<128x128xbf16>
    %c5 = arith.constant 5 : index
    %c0_51 = arith.constant 0 : index
    %c0_52 = arith.constant 0 : index
    %55 = vector.load %arg5[%c5, %c0_51, %c0_52] : memref<9x128x128xbf16, #tpu.memory_space<vmem>>, vector<1x128x128xbf16>
    %56 = vector.shape_cast %55 : vector<1x128x128xbf16> to vector<128x128xbf16>
    %cst_53 = arith.constant dense<0.000000e+00> : vector<128x128xf32>
    %57 = tpu.matmul %54, %56, %cst_53 {dimension_numbers = #tpu.dot_dimension_numbers<[1], [0], [0], [1], [0, 0, 1, 1], [], []>} : vector<128x128xbf16>, vector<128x128xbf16>, vector<128x128xf32> -> vector<128x128xf32>
    %58 = arith.addf %52, %57 : vector<128x128xf32>
    %c2_54 = arith.constant 2 : index
    %c15_55 = arith.constant 15 : index
    %c0_56 = arith.constant 0 : index
    %59 = vector.load %arg8[%c2_54, %c15_55, %c0_56] : memref<10x48x128xbf16, #tpu.memory_space<vmem>>, vector<8x16x128xbf16>
    %60 = vector.shape_cast %59 : vector<8x16x128xbf16> to vector<128x128xbf16>
    %c6 = arith.constant 6 : index
    %c0_57 = arith.constant 0 : index
    %c0_58 = arith.constant 0 : index
    %61 = vector.load %arg5[%c6, %c0_57, %c0_58] : memref<9x128x128xbf16, #tpu.memory_space<vmem>>, vector<1x128x128xbf16>
    %62 = vector.shape_cast %61 : vector<1x128x128xbf16> to vector<128x128xbf16>
    %cst_59 = arith.constant dense<0.000000e+00> : vector<128x128xf32>
    %63 = tpu.matmul %60, %62, %cst_59 {dimension_numbers = #tpu.dot_dimension_numbers<[1], [0], [0], [1], [0, 0, 1, 1], [], []>} : vector<128x128xbf16>, vector<128x128xbf16>, vector<128x128xf32> -> vector<128x128xf32>
    %64 = arith.addf %58, %63 : vector<128x128xf32>
    %c2_60 = arith.constant 2 : index
    %c16_61 = arith.constant 16 : index
    %c0_62 = arith.constant 0 : index
    %65 = vector.load %arg8[%c2_60, %c16_61, %c0_62] : memref<10x48x128xbf16, #tpu.memory_space<vmem>>, vector<8x16x128xbf16>
    %66 = vector.shape_cast %65 : vector<8x16x128xbf16> to vector<128x128xbf16>
    %c7 = arith.constant 7 : index
    %c0_63 = arith.constant 0 : index
    %c0_64 = arith.constant 0 : index
    %67 = vector.load %arg5[%c7, %c0_63, %c0_64] : memref<9x128x128xbf16, #tpu.memory_space<vmem>>, vector<1x128x128xbf16>
    %68 = vector.shape_cast %67 : vector<1x128x128xbf16> to vector<128x128xbf16>
    %cst_65 = arith.constant dense<0.000000e+00> : vector<128x128xf32>
    %69 = tpu.matmul %66, %68, %cst_65 {dimension_numbers = #tpu.dot_dimension_numbers<[1], [0], [0], [1], [0, 0, 1, 1], [], []>} : vector<128x128xbf16>, vector<128x128xbf16>, vector<128x128xf32> -> vector<128x128xf32>
    %70 = arith.addf %64, %69 : vector<128x128xf32>
    %c2_66 = arith.constant 2 : index
    %c17_67 = arith.constant 17 : index
    %c0_68 = arith.constant 0 : index
    %71 = vector.load %arg8[%c2_66, %c17_67, %c0_68] : memref<10x48x128xbf16, #tpu.memory_space<vmem>>, vector<8x16x128xbf16>
    %72 = vector.shape_cast %71 : vector<8x16x128xbf16> to vector<128x128xbf16>
    %c8 = arith.constant 8 : index
    %c0_69 = arith.constant 0 : index
    %c0_70 = arith.constant 0 : index
    %73 = vector.load %arg5[%c8, %c0_69, %c0_70] : memref<9x128x128xbf16, #tpu.memory_space<vmem>>, vector<1x128x128xbf16>
    %74 = vector.shape_cast %73 : vector<1x128x128xbf16> to vector<128x128xbf16>
    %cst_71 = arith.constant dense<0.000000e+00> : vector<128x128xf32>
    %75 = tpu.matmul %72, %74, %cst_71 {dimension_numbers = #tpu.dot_dimension_numbers<[1], [0], [0], [1], [0, 0, 1, 1], [], []>} : vector<128x128xbf16>, vector<128x128xbf16>, vector<128x128xf32> -> vector<128x128xf32>
    %76 = arith.addf %70, %75 : vector<128x128xf32>
    %c0_72 = arith.constant 0 : index
    %c0_73 = arith.constant 0 : index
    %77 = vector.load %arg6[%c0_72, %c0_73] : memref<1x128xf32, #tpu.memory_space<vmem>>, vector<1x128xf32>
    %78 = vector.broadcast %77 : vector<1x128xf32> to vector<128x128xf32>
    %79 = arith.addf %76, %78 : vector<128x128xf32>
    %cst_74 = arith.constant 0.000000e+00 : f32
    %80 = vector.broadcast %cst_74 : f32 to vector<128x128xf32>
    %81 = arith.maximumf %79, %80 : vector<128x128xf32>
    %82 = vector.extract_strided_slice %81 {offsets = [0, 0], sizes = [128, 8], strides = [1, 1]} : vector<128x128xf32> to vector<128x8xf32>
    %83 = vector.shape_cast %82 : vector<128x8xf32> to vector<1x8x16x8xf32>
    %c0_75 = arith.constant 0 : index
    %c0_76 = arith.constant 0 : index
    %c0_77 = arith.constant 0 : index
    %c0_78 = arith.constant 0 : index
    %84 = vector.load %arg7[%c0_75, %c0_76, %c0_77, %c0_78] : memref<1x8x16x8xf32, #tpu.memory_space<vmem>>, vector<1x8x16x8xf32>
    tpu.vector_store %arg7[%c0_75, %c0_76, %c0_77, %c0_78], %83 {strides = array<i32>} : memref<1x8x16x8xf32, #tpu.memory_space<vmem>>, vector<1x8x16x8xf32>,
    return
  }
  func.func @transform_0(%arg0: i32, %arg1: i32) -> (i32, i32, i32, i32) {
    %c2_i32 = arith.constant 2 : i32
    %0 = arith.muli %arg0, %c2_i32 : i32
    %1 = arith.addi %0, %arg1 : i32
    %c0_i32 = arith.constant 0 : i32
    %c0_i32_0 = arith.constant 0 : i32
    %c0_i32_1 = arith.constant 0 : i32
    %c0_i32_2 = arith.constant 0 : i32
    return %1, %c0_i32, %c0_i32_0, %c0_i32_1 : i32, i32, i32, i32
  }
  func.func @transform_1(%arg0: i32, %arg1: i32) -> (i32, i32) {
    %c0_i32 = arith.constant 0 : i32
    %c0_i32_0 = arith.constant 0 : i32
    %c0_i32_1 = arith.constant 0 : i32
    return %c0_i32, %c0_i32_0 : i32, i32
  }
  func.func @transform_2(%arg0: i32, %arg1: i32) -> (i32, i32) {
    %c0_i32 = arith.constant 0 : i32
    %c0_i32_0 = arith.constant 0 : i32
    %c0_i32_1 = arith.constant 0 : i32
    return %c0_i32, %c0_i32_0 : i32, i32
  }
  func.func @transform_3(%arg0: i32, %arg1: i32) -> (i32, i32, i32) {
    %c0_i32 = arith.constant 0 : i32
    %c0_i32_0 = arith.constant 0 : i32
    %c0_i32_1 = arith.constant 0 : i32
    %c0_i32_2 = arith.constant 0 : i32
    return %c0_i32, %c0_i32_0, %c0_i32_1 : i32, i32, i32
  }
  func.func @transform_4(%arg0: i32, %arg1: i32) -> (i32, i32) {
    %c0_i32 = arith.constant 0 : i32
    %c0_i32_0 = arith.constant 0 : i32
    %c0_i32_1 = arith.constant 0 : i32
    return %c0_i32, %c0_i32_0 : i32, i32
  }
  func.func @transform_5(%arg0: i32, %arg1: i32) -> (i32, i32, i32, i32) {
    %c0_i32 = arith.constant 0 : i32
    %c0_i32_0 = arith.constant 0 : i32
    %c0_i32_1 = arith.constant 0 : i32
    return %arg0, %arg1, %c0_i32, %c0_i32_0 : i32, i32, i32, i32
  }
}

</mosaic_0001>

<bundles_post_ra>
// kernel: double_conv.1
= control target key start
LH: loop header
LB: loop body
LE: loop exit
PB: predicated region body
PF: predicated region fallthrough
CT: control target
= control target key end

     0   :  { %s4144_s18 = smov 0   ;;  %s4146_s19 = smov 0   ;;  %s4850_s0 = inlined_call_operand.vmem [shape: bf16[4,10,16,128], index: 0, kind: input, shape index: {}]   ;;  %s4851_s1 = inlined_call_operand.vmem [shape: bf16[128,128], index: 1, kind: input, shape index: {}]   ;;  %s4852_s2 = inlined_call_operand.vmem [shape: f32[1,128], index: 2, kind: input, shape index: {}]   ;;  %s4853_s3 = inlined_call_operand.vmem [shape: bf16[9,128,128], index: 3, kind: input, shape index: {}]   ;;  %s4854_s4 = inlined_call_operand.vmem [shape: f32[1,128], index: 4, kind: input, shape index: {}]   ;;  %s4855_s5 = inlined_call_operand.vmem [shape: f32[2,16,16,8], index: 5, kind: output, shape index: {}]  }
   0x1   :  { %s4148_s20 = smov 0   ;;  %s4150_s21 = smov 0  }
   0x2   :  { %s4152_s22 = smov 0  }
   0x3 LB: > { %s24_s23 = sadd.s32 1, %s4102_s20  ;;  %s27_s24 = sadd.s32 1, %s4106_s21  ;;  %s4110_s22 = sphi %s4152_s22, %s15_s22   ;;  %s4106_s21 = sphi %s4150_s21, %s4863_s21   ;;  %s4102_s20 = sphi %s4148_s20, %s4862_s20   ;;  %s4098_s19 = sphi %s4146_s19, %s4861_s19   ;;  %s4094_s18 = sphi %s4144_s18, %s4860_s18  }
   0x4   : > { %p25_p0 = scmp.ge.s32.totalorder %s24_s23, 2  ;;  %p3094_p1 = scmp.ge.s32.totalorder %s4110_s22, 1 }
   0x5   : > { %p209_p2 = scmp.lt.s32.totalorder %s4110_s22, 5 }
   0x6   : > { %s4865_s23 = smov (%p25_p0, %s24_s23), 0  ;;  %s4867_s24 = smov (!%p25_p0, %s27_s24), %s4106_s21 }
   0x7   : > { %p210_p3 = pnand %p3094_p1, %p209_p2  ;;  %p29_p4 = scmp.ge.s32.totalorder %s4867_s24, 2 }
   0x8   : > { %s3097_s25 = sshll.u32 (!%p210_p3), %s4094_s18, 3  ;;  %p254_p5 = scmp.lt.s32.totalorder (!%p210_p3), %s4098_s19, 1  ;;  %v3982_v0 = vld [vmem:[%s4851_s1] sm:$0xff] (!%p210_p3)   ;;  %v3983_v1 = vld [vmem:[%s4851_s1 + $0x8] sm:$0xff] (!%p210_p3)   ;;  %v3984_v2 = vld [vmem:[%s4851_s1 + $0x10] sm:$0xff] (!%p210_p3)   ;;  %vm569_vm0 = vcmask (!%p210_p3), 1047559  }
   0x9   : > { %s4869_s24 = smov (%p29_p4, %s4867_s24), 0  ;;  %213 = sbr.rel (%p210_p3) target bundleno = 713 (0x2c9), region = 40 }
   0xa   : > { %p256_p6 = scmp.lt.s32.totalorder (!%p210_p3), %s3097_s25, 15  ;;  %3487 = vmatprep.subr.bf16.mxu0 (!%p210_p3), %v3982_v0  ;;  %s3095_s11 = sshll.u32 (!%p210_p3), %s4098_s19, 1  ;;  %v3985_v3 = vld [vmem:[%s4851_s1 + $0x18] sm:$0xff] (!%p210_p3)   ;;  %v3986_v4 = vld [vmem:[%s4851_s1 + $0x20] sm:$0xff] (!%p210_p3)   ;;  %v3987_v6 = vld [vmem:[%s4851_s1 + $0x28] sm:$0xff] (!%p210_p3)   ;;  %vm602_vm2 = vcmask (!%p210_p3), 1040384  }
   0xb   : > { %3488 = vmatpush3.bf16.msra.mxu0 (!%p210_p3), %v3982_v0  ;;  %s245_s13 = sadd.s32 (!%p210_p3), %s4094_s18, %s3095_s11  ;;  %v3988_v7 = vld [vmem:[%s4851_s1 + $0x30] sm:$0xff] (!%p210_p3)   ;;  %v3989_v8 = vld [vmem:[%s4851_s1 + $0x38] sm:$0xff] (!%p210_p3)   ;;  %vm570_vm1 = vsmask.f32 (!%p210_p3), 7966  ;;  %v572_v19 = vld [vmem:[#allocation2] sm:$0x80] (!%p210_p3) }
   0xc   : > { %3489 = vmatprep.subr.bf16.mxu0 (!%p210_p3), %v3983_v1  ;;  %p246_p7 = scmp.lt.s32.totalorder (!%p210_p3), %s245_s13, 3  ;;  %vm4227_vm3 = vmand (!%p210_p3), %vm569_vm0, %vm570_vm1  ;;  %v575_v20 = vld [vmem:[#allocation2 + $0x18] sm:$0x80] (!%p210_p3)  ;;  %vm603_vm4 = vsmask.f32 (!%p210_p3), 256  ;;  %p3120_p8 = scmp.ne.s32.totalorder (!%p210_p3), %s4094_s18, 0 }
   0xd   : > { %v573_v21 = vsel (!%p210_p3), %vm4227_vm3, 0, %v572_v19  ;;  %v576_v22 = vsel (!%p210_p3), %vm4227_vm3, 0, %v575_v20  ;;  %v578_v23 = vld [vmem:[#allocation2 + $0x30] sm:$0x80] (!%p210_p3)  ;;  %v581_v24 = vld [vmem:[#allocation2 + $0x48] sm:$0x80] (!%p210_p3)  ;;  %vm4245_vm5 = vmand (!%p210_p3), %vm602_vm2, %vm603_vm4 }
   0xe   : > { %574 = vst [vmem:[#allocation2] sm:$0x80] (!%p210_p3), %v573_v21  ;;  %577 = vst [vmem:[#allocation2 + $0x18] sm:$0x80] (!%p210_p3), %v576_v22  ;;  %v579_v25 = vsel (!%p210_p3), %vm4227_vm3, 0, %v578_v23  ;;  %v582_v26 = vsel (!%p210_p3), %vm4227_vm3, 0, %v581_v24 }
   0xf   : > { %3490 = vmatpush3.bf16.msra.mxu0 (!%p210_p3), %v3983_v1  ;;  %v584_v27 = vld [vmem:[#allocation2 + $0x60] sm:$0x80] (!%p210_p3)  ;;  %v587_v28 = vld [vmem:[#allocation2 + $0x78] sm:$0x80] (!%p210_p3)  ;;  %580 = vst [vmem:[#allocation2 + $0x30] sm:$0x80] (!%p210_p3), %v579_v25 }
  0x10   : > { %s255_s28 = scalar_select %p254_p5, %s4098_s19, 1  ;;  %3491 = vmatprep.subr.bf16.mxu0 %v3984_v2  ;;  %583 = vst [vmem:[#allocation2 + $0x48] sm:$0x80] %v582_v26  ;;  %v585_v29 = vsel %vm4227_vm3, 0, %v584_v27  ;;  %v588_v30 = vsel %vm4227_vm3, 0, %v587_v28 }
  0x11   : > { %s4871_s25 = smov (!%p256_p6, %s3097_s25), 15  ;;  %s4873_s13 = smov (!%p246_p7, %s245_s13), 3  ;;  %v590_v31 = vld [vmem:[#allocation2 + $0x90] sm:$0x80]  ;;  %v593_v32 = vld [vmem:[#allocation2 + $0xa8] sm:$0x80] }
  0x12   : > { %s3099_s6 = sshll.u32 %s255_s28, 5  ;;  %s3098_s7 = sshll.u32 %s4871_s25, 1  ;;  %586 = vst [vmem:[#allocation2 + $0x60] sm:$0x80] %v585_v29  ;;  %589 = vst [vmem:[#allocation2 + $0x78] sm:$0x80] %v588_v30 }
  0x13   : > { %s260_s10 = sadd.s32 %s3099_s6, %s3098_s7  ;;  %3492 = vmatpush3.bf16.msra.mxu0 %v3984_v2  ;;  %s3939_s25 = smul.u32 80, %s4873_s13  ;;  %v591_v34 = vsel %vm4227_vm3, 0, %v590_v31  ;;  %v594_v35 = vsel %vm4227_vm3, 0, %v593_v32  ;;  %v596_v36 = vld [vmem:[#allocation2 + $0xc0] sm:$0x80] }
  0x14   : > { %s3100_s12 = sshll.u32 %s260_s10, 3  ;;  %3493 = vmatprep.subr.bf16.mxu0 %v3985_v3  ;;  %v599_v37 = vld [vmem:[#allocation2 + $0xd8] sm:$0x80]  ;;  %592 = vst [vmem:[#allocation2 + $0x90] sm:$0x80] %v591_v34  ;;  %v597_v38 = vsel %vm4227_vm3, 0, %v596_v36 }
  0x15   : > { %s4195_s16 = scalar_lea.vmem %s4855_s5, %s3100_s12  ;;  %s4206_s30 = scalar_lea.vmem %s4850_s0, %s3939_s25  ;;  %595 = vst [vmem:[#allocation2 + $0xa8] sm:$0x80] %v594_v35  ;;  %v600_v39 = vsel %vm4227_vm3, 0, %v599_v37  ;;  %v605_v40 = vld [vmem:[#allocation2 + $0x10] sm:$0x1] }
  0x16   : > { %v3990_v5 = vld [vmem:[%s4206_s30] sm:$0xff]   ;;  %v3991_v9 = vld [vmem:[%s4206_s30 + $0x8] sm:$0xff]   ;;  %v3992_v10 = vld [vmem:[%s4206_s30 + $0x10] sm:$0xff]   ;;  %598 = vst [vmem:[#allocation2 + $0xc0] sm:$0x80] %v597_v38  ;;  %v606_v42 = vsel %vm4245_vm5, 0, %v605_v40 }
  0x17   : > { %3494 = vmatpush3.bf16.msra.mxu0 %v3985_v3  ;;  %3503 = vmatprep.mubr.bf16.mxu0 %v3990_v5  ;;  %v3993_v11 = vld [vmem:[%s4206_s30 + $0x18] sm:$0xff]   ;;  %v3994_v12 = vld [vmem:[%s4206_s30 + $0x20] sm:$0xff]   ;;  %v3995_v13 = vld [vmem:[%s4206_s30 + $0x28] sm:$0xff]   ;;  %601 = vst [vmem:[#allocation2 + $0xd8] sm:$0x80] %v600_v39 }
  0x18   : > { %3495 = vmatprep.subr.bf16.mxu0 %v3986_v4  ;;  %v3996_v14 = vld [vmem:[%s4206_s30 + $0x30] sm:$0xff]   ;;  %v3997_v15 = vld [vmem:[%s4206_s30 + $0x38] sm:$0xff]   ;;  %v3998_v16 = vld [vmem:[%s4206_s30 + $0x40] sm:$0xff]   ;;  %607 = vst [vmem:[#allocation2 + $0x10] sm:$0x1] %v606_v42 }
  0x19   : > { %v3999_v17 = vld [vmem:[%s4206_s30 + $0x48] sm:$0xff]   ;;  %v611_v44 = vld [vmem:[#allocation2 + $0x40] sm:$0x1]  ;;  %v614_v45 = vld [vmem:[#allocation2 + $0x58] sm:$0x1] }
  0x1a   : > { %v608_v41 = vld [vmem:[#allocation2 + $0x28] sm:$0x1]  ;;  %v612_v46 = vsel %vm4245_vm5, 0, %v611_v44  ;;  %v615_v47 = vsel %vm4245_vm5, 0, %v614_v45  ;;  %v617_v48 = vld [vmem:[#allocation2 + $0x70] sm:$0x1] }
  0x1b   : > { %3496 = vmatpush3.bf16.msra.mxu0 %v3986_v4  ;;  %v609_v43 = vsel %vm4245_vm5, 0, %v608_v41  ;;  %v620_v49 = vld [vmem:[#allocation2 + $0x88] sm:$0x1]  ;;  %613 = vst [vmem:[#allocation2 + $0x40] sm:$0x1] %v612_v46  ;;  %v618_v50 = vsel %vm4245_vm5, 0, %v617_v48 }
  0x1c   : > { %3497 = vmatprep.subr.bf16.mxu0 %v3987_v6  ;;  %610 = vst [vmem:[#allocation2 + $0x28] sm:$0x1] %v609_v43  ;;  %616 = vst [vmem:[#allocation2 + $0x58] sm:$0x1] %v615_v47  ;;  %v621_v51 = vsel %vm4245_vm5, 0, %v620_v49 }
  0x1d   : > { %v623_v52 = vld [vmem:[#allocation2 + $0xa0] sm:$0x1]  ;;  %v626_v53 = vld [vmem:[#allocation2 + $0xb8] sm:$0x1]  ;;  %619 = vst [vmem:[#allocation2 + $0x70] sm:$0x1] %v618_v50 }
  0x1e   : > { %622 = vst [vmem:[#allocation2 + $0x88] sm:$0x1] %v621_v51  ;;  %v624_v54 = vsel %vm4245_vm5, 0, %v623_v52  ;;  %v627_v55 = vsel %vm4245_vm5, 0, %v626_v53  ;;  %v629_v56 = vld [vmem:[#allocation2 + $0xd0] sm:$0x1] }
  0x1f   : > { %3498 = vmatpush3.bf16.msra.mxu0 %v3987_v6  ;;  %v632_v57 = vld [vmem:[#allocation2 + $0xe8] sm:$0x1]  ;;  %625 = vst [vmem:[#allocation2 + $0xa0] sm:$0x1] %v624_v54  ;;  %628 = vst [vmem:[#allocation2 + $0xb8] sm:$0x1] %v627_v55 }
  0x20   : > { %3499 = vmatprep.subr.bf16.mxu0 %v3988_v7  ;;  %v630_v58 = vsel %vm4245_vm5, 0, %v629_v56  ;;  %v633_v59 = vsel %vm4245_vm5, 0, %v632_v57  ;;  %v4280_v60 = vld [vmem:[%s4852_s2] ss:$0 sm:$0xff] }
  0x21   : > { %631 = vst [vmem:[#allocation2 + $0xd0] sm:$0x1] %v630_v58  ;;  %634 = vst [vmem:[#allocation2 + $0xe8] sm:$0x1] %v633_v59 }
  0x23   : > { %3500 = vmatpush3.bf16.msra.mxu0 %v3988_v7 }
  0x24   : > { %3501 = vmatprep.subr.bf16.mxu0 %v3989_v8 }
  0x27   : > { %3502 = vmatpush3.bf16.msra.mxu0 %v3989_v8 }
  0x2a   : > { %3504 = vmatmul.mubr.bf16.vlgmr.msra.gmra.mrb[0].mxu0 %v3991_v9 }
  0x2b   : > { %3507 = vmatprep.mubr.bf16.mxu0 %v3992_v10 }
  0x32   : > { %3508 = vmatmul.mubr.bf16.gmra.mrb[4].mxu0 %v3993_v11 }
  0x33   : > { %3511 = vmatprep.mubr.bf16.mxu0 %v3994_v12 }
  0x3a   : > { %3512 = vmatmul.mubr.bf16.gmra.mrb[8].mxu0 %v3995_v13 }
  0x3b   : > { %3515 = vmatprep.mubr.bf16.mxu0 %v3996_v14 }
  0x42   : > { %3516 = vmatmul.mubr.bf16.gmra.mrb[12].mxu0 %v3997_v15 }
  0x43   : > { %3519 = vmatprep.mubr.bf16.mxu0 %v3998_v16 }
  0x4a   : > { %3520 = vmatmul.mubr.bf16.gmra.mrb[16].mxu0 %v3999_v17 }
  0xfd   : > { %v3505_v61 = vpop.f32.mrb[0].mxu0 }
  0xfe   : > { %v459_v62 = vadd.f32 %v3505_v61, %v4280_v60  ;;  %v450_v63 = vpop.f32.mrb[1].mxu0 }
  0xff   : > { %v451_v0 = vadd.f32 %v4280_v60, %v450_v63  ;;  %v3506_v1 = vpop.f32.mrb[2].mxu0 }
 0x100   : > { %v462_v2 = vadd.f32 %v3506_v1, %v4280_v60  ;;  %v453_v3 = vpop.f32.mrb[3].mxu0  ;;  %v531_v5 = vmax.f32 %v459_v62, 0.0 }
 0x101   : > { %v454_v4 = vadd.f32 %v4280_v60, %v453_v3  ;;  %v529_v7 = vmax.f32 %v451_v0, 0.0 }
 0x102   : > { %v532_v6 = vmax.f32 %v462_v2, 0.0 }
 0x103   : > { %v530_v8 = vmax.f32 %v454_v4, 0.0  ;;  %v4112_v4 = vmov (!%p3120_p8), 0  }
 0x104   : > { %v550_v9 = vpack.c.bf16 %v532_v6, %v531_v5  ;;  %639 = vst [vmem:[#allocation2] sm:$0xff] (!%p3120_p8), %v4112_v4  ;;  %641 = vst [vmem:[#allocation2 + $0x10] sm:$0xff] (!%p3120_p8), %v4112_v4 }
 0x105   : > { %v549_v10 = vpack.c.bf16 %v530_v8, %v529_v7  ;;  %v3509_v11 = vpop.f32.mrb[4].mxu0 }
 0x106   : > { %560 = vst [vmem:[#allocation2 + $0x20] sm:$0xff] %v550_v9  ;;  %v475_v12 = vadd.f32 %v3509_v11, %v4280_v60  ;;  %v466_v13 = vpop.f32.mrb[5].mxu0 }
 0x107   : > { %559 = vst [vmem:[#allocation2 + $0x8] sm:$0xff] %v549_v10  ;;  %v467_v14 = vadd.f32 %v4280_v60, %v466_v13  ;;  %v3510_v15 = vpop.f32.mrb[6].mxu0 }
 0x108   : > { %v478_v16 = vadd.f32 %v3510_v15, %v4280_v60  ;;  %v469_v17 = vpop.f32.mrb[7].mxu0  ;;  %v535_v19 = vmax.f32 %v475_v12, 0.0  ;;  %640 = vst [vmem:[#allocation2 + $0x8] sm:$0xff] (!%p3120_p8), %v4112_v4 }
 0x109   : > { %v470_v18 = vadd.f32 %v4280_v60, %v469_v17  ;;  %v533_v21 = vmax.f32 %v467_v14, 0.0 }
 0x10a   : > { %v536_v20 = vmax.f32 %v478_v16, 0.0 }
 0x10b   : > { %v534_v22 = vmax.f32 %v470_v18, 0.0 }
 0x10c   : > { %v552_v23 = vpack.c.bf16 %v536_v20, %v535_v19 }
 0x10d   : > { %v551_v24 = vpack.c.bf16 %v534_v22, %v533_v21  ;;  %v3513_v25 = vpop.f32.mrb[8].mxu0 }
 0x10e   : > { %562 = vst [vmem:[#allocation2 + $0x50] sm:$0xff] %v552_v23  ;;  %v491_v26 = vadd.f32 %v3513_v25, %v4280_v60  ;;  %v482_v27 = vpop.f32.mrb[9].mxu0 }
 0x10f   : > { %561 = vst [vmem:[#allocation2 + $0x38] sm:$0xff] %v551_v24  ;;  %v483_v28 = vadd.f32 %v4280_v60, %v482_v27  ;;  %v3514_v29 = vpop.f32.mrb[10].mxu0 }
 0x110   : > { %v494_v30 = vadd.f32 %v3514_v29, %v4280_v60  ;;  %v485_v31 = vpop.f32.mrb[11].mxu0  ;;  %v539_v33 = vmax.f32 %v491_v26, 0.0 }
 0x111   : > { %v486_v32 = vadd.f32 %v4280_v60, %v485_v31  ;;  %v537_v35 = vmax.f32 %v483_v28, 0.0 }
 0x112   : > { %v540_v34 = vmax.f32 %v494_v30, 0.0 }
 0x113   : > { %v538_v36 = vmax.f32 %v486_v32, 0.0 }
 0x114   : > { %v554_v37 = vpack.c.bf16 %v540_v34, %v539_v33 }
 0x115   : > { %v553_v38 = vpack.c.bf16 %v538_v36, %v537_v35  ;;  %v3517_v39 = vpop.f32.mrb[12].mxu0 }
 0x116   : > { %564 = vst [vmem:[#allocation2 + $0x80] sm:$0xff] %v554_v37  ;;  %v507_v40 = vadd.f32 %v3517_v39, %v4280_v60  ;;  %v498_v41 = vpop.f32.mrb[13].mxu0 }
 0x117   : > { %563 = vst [vmem:[#allocation2 + $0x68] sm:$0xff] %v553_v38  ;;  %v499_v42 = vadd.f32 %v4280_v60, %v498_v41  ;;  %v3518_v43 = vpop.f32.mrb[14].mxu0 }
 0x118   : > { %v510_v44 = vadd.f32 %v3518_v43, %v4280_v60  ;;  %v501_v45 = vpop.f32.mrb[15].mxu0  ;;  %v543_v47 = vmax.f32 %v507_v40, 0.0 }
 0x119   : > { %v502_v46 = vadd.f32 %v4280_v60, %v501_v45  ;;  %v541_v49 = vmax.f32 %v499_v42, 0.0 }
 0x11a   : > { %v544_v48 = vmax.f32 %v510_v44, 0.0 }
 0x11b   : > { %v542_v50 = vmax.f32 %v502_v46, 0.0 }
 0x11c   : > { %v556_v51 = vpack.c.bf16 %v544_v48, %v543_v47 }
 0x11d   : > { %v555_v52 = vpack.c.bf16 %v542_v50, %v541_v49  ;;  %v3521_v53 = vpop.f32.mrb[16].mxu0 }
 0x11e   : > { %566 = vst [vmem:[#allocation2 + $0xb0] sm:$0xff] %v556_v51  ;;  %v523_v54 = vadd.f32 %v3521_v53, %v4280_v60  ;;  %v514_v55 = vpop.f32.mrb[17].mxu0 }
 0x11f   : > { %565 = vst [vmem:[#allocation2 + $0x98] sm:$0xff] %v555_v52  ;;  %v515_v56 = vadd.f32 %v4280_v60, %v514_v55  ;;  %v3522_v57 = vpop.f32.mrb[18].mxu0 }
 0x120   : > { %v526_v58 = vadd.f32 %v3522_v57, %v4280_v60  ;;  %v517_v59 = vpop.f32.mrb[19].mxu0  ;;  %v547_v62 = vmax.f32 %v523_v54, 0.0 }
 0x121   : > { %v518_v61 = vadd.f32 %v4280_v60, %v517_v59  ;;  %v545_v0 = vmax.f32 %v515_v56, 0.0  ;;  %638 = sbr.rel (%p3120_p8) target bundleno = 296 (0x128), region = 44 }
 0x122   : > { %v548_v63 = vmax.f32 %v526_v58, 0.0 }
 0x123   : > { %v546_v1 = vmax.f32 %v518_v61, 0.0 }
 0x124   : > { %v558_v2 = vpack.c.bf16 %v548_v63, %v547_v62 }
 0x125   : > { %v557_v3 = vpack.c.bf16 %v546_v1, %v545_v0 }
 0x126   : > { %568 = vst [vmem:[#allocation2 + $0xe0] sm:$0xff] %v558_v2 }
 0x127   : > { %567 = vst [vmem:[#allocation2 + $0xc8] sm:$0xff] %v557_v3 }
 0x128 PF: > { %p3121_p9 = scmp.ne.s32.totalorder %s4094_s18, 1 }
 0x129   : > { %v4113_v60 = vmov (!%p3121_p9), 0  }
 0x12a   : > { %645 = sbr.rel (%p3121_p9) target bundleno = 305 (0x131), region = 48  ;;  %647 = vst [vmem:[#allocation2 + $0xd8] sm:$0xff] (!%p3121_p9), %v4113_v60  ;;  %648 = vst [vmem:[#allocation2 + $0xe0] sm:$0xff] (!%p3121_p9), %v4113_v60 }
 0x12b   : > { %649 = vst [vmem:[#allocation2 + $0xe8] sm:$0xff] (!%p3121_p9), %v4113_v60 }
 0x131 PF: > { %v4000_v5 = vld [vmem:[%s4853_s3 + $0x40] sm:$0xff]   ;;  %v4002_v7 = vld [vmem:[%s4853_s3 + $0x48] sm:$0xff]   ;;  %v4004_v9 = vld [vmem:[%s4853_s3 + $0x50] sm:$0xff]   ;;  %vm1109_vm6 = vsmask.f32 7424  ;;  %vm2981_vm7 = vcmask 64512  }
 0x132   : > { %v4001_v6 = vld [vmem:[%s4853_s3 + $0x100] sm:$0xff]   ;;  %3523 = vmatprep.subr.bf16.mxu0 %v4000_v5  ;;  %v4003_v8 = vld [vmem:[%s4853_s3 + $0x108] sm:$0xff]   ;;  %v4005_v10 = vld [vmem:[%s4853_s3 + $0x110] sm:$0xff]  }
 0x133   : > { %3651 = vmatprep.subr.bf16.mxu1 %v4001_v6  ;;  %3524 = vmatpush3.bf16.msra.mxu0 %v4000_v5  ;;  %v4006_v11 = vld [vmem:[%s4853_s3 + $0x58] sm:$0xff]   ;;  %v4008_v13 = vld [vmem:[%s4853_s3 + $0x60] sm:$0xff]   ;;  %v4010_v15 = vld [vmem:[%s4853_s3 + $0x68] sm:$0xff]  }
 0x134   : > { %3652 = vmatpush3.bf16.msra.mxu1 %v4001_v6  ;;  %3525 = vmatprep.subr.bf16.mxu0 %v4002_v7  ;;  %v4007_v12 = vld [vmem:[%s4853_s3 + $0x118] sm:$0xff]   ;;  %v4009_v14 = vld [vmem:[%s4853_s3 + $0x120] sm:$0xff]   ;;  %v4337_v16 = vld [vmem:[#allocation2 + $0x8] sm:$0xff] }
 0x135   : > { %3653 = vmatprep.subr.bf16.mxu1 %v4003_v8  ;;  %v4339_v17 = vld [vmem:[#allocation2 + $0x20] sm:$0xff]  ;;  %v4011_v18 = vld [vmem:[%s4853_s3 + $0x128] sm:$0xff]   ;;  %3539 = vmatprep.mubr.bf16.mxu0 %v4337_v16  ;;  %v4012_v19 = vld [vmem:[%s4853_s3 + $0x70] sm:$0xff]   ;;  %v671_v35 = vshrl.u32 %v4337_v16, 16  ;;  %v674_v37 = vshll.u32 %v4337_v16, 16 }
 0x136   : > { %3667 = vmatprep.mubr.bf16.mxu1 %v4339_v17  ;;  %v4013_v20 = vld [vmem:[%s4853_s3 + $0x130] sm:$0xff]   ;;  %v4014_v21 = vld [vmem:[%s4853_s3 + $0x78] sm:$0xff]   ;;  %v4016_v23 = vld [vmem:[%s4853_s3] sm:$0xff]   ;;  %v1414_v38 = vshrl.u32 %v4339_v17, 16  ;;  %v1417_v39 = vshll.u32 %v4339_v17, 16 }
 0x137   : > { %3526 = vmatpush3.bf16.msra.mxu0 %v4002_v7  ;;  %v4015_v22 = vld [vmem:[%s4853_s3 + $0x138] sm:$0xff]   ;;  %v4017_v24 = vld [vmem:[%s4853_s3 + $0x140] sm:$0xff]   ;;  %v4018_v26 = vld [vmem:[%s4853_s3 + $0x8] sm:$0xff]   ;;  %v673_v47 = vrot.slane %v671_v35, 7 }
 0x138   : > { %3654 = vmatpush3.bf16.msra.mxu1 %v4003_v8  ;;  %3527 = vmatprep.subr.bf16.mxu0 %v4004_v9  ;;  %v4364_v25 = vld [vmem:[#allocation2 + $0x38] sm:$0xff]  ;;  %v4019_v27 = vld [vmem:[%s4853_s3 + $0x148] sm:$0xff]   ;;  %v4374_v28 = vld [vmem:[#allocation2 + $0x50] sm:$0xff]  ;;  %v1416_v48 = vrot.slane %v1414_v38, 7  ;;  %v1890_v50 = vrot.slane %v1417_v39, 1 }
 0x139   : > { %3655 = vmatprep.subr.bf16.mxu1 %v4005_v10  ;;  %v4020_v29 = vld [vmem:[%s4853_s3 + $0x10] sm:$0xff]   ;;  %v4384_v31 = vld [vmem:[#allocation2 + $0x68] sm:$0xff]  ;;  %v4022_v32 = vld [vmem:[%s4853_s3 + $0x18] sm:$0xff]   ;;  %v1426_v41 = vshrl.u32 %v4364_v25, 16  ;;  %v1429_v42 = vshll.u32 %v4364_v25, 16  ;;  %v1438_v52 = vshrl.u32 %v4374_v28, 16  ;;  %v676_v2 = vor.u32 %v674_v37, %v673_v47 }
 0x13a   : > { %v4021_v30 = vld [vmem:[%s4853_s3 + $0x150] sm:$0xff]   ;;  %v4023_v33 = vld [vmem:[%s4853_s3 + $0x158] sm:$0xff]   ;;  %v4394_v34 = vld [vmem:[#allocation2 + $0x80] sm:$0xff]  ;;  %v1441_v58 = vshll.u32 %v4374_v28, 16  ;;  %v1450_v62 = vshrl.u32 %v4384_v31, 16  ;;  %v4445_v4 = vor.u32 %v1890_v50, %v1414_v38  ;;  %v1453_v7 = vshll.u32 %v4384_v31, 16 }
 0x13b   : > { %3528 = vmatpush3.bf16.msra.mxu0 %v4004_v9  ;;  %v4024_v36 = vld [vmem:[%s4853_s3 + $0x20] sm:$0xff]   ;;  %v4410_v43 = vld [vmem:[#allocation2 + $0x98] sm:$0xff]  ;;  %v4026_v44 = vld [vmem:[%s4853_s3 + $0x28] sm:$0xff]   ;;  %v1428_v51 = vrot.slane %v1426_v41, 7  ;;  %v1902_v54 = vrot.slane %v1429_v42, 1 }
 0x13c   : > { %3656 = vmatpush3.bf16.msra.mxu1 %v4005_v10  ;;  %3529 = vmatprep.subr.bf16.mxu0 %v4006_v11  ;;  %v4025_v40 = vld [vmem:[%s4853_s3 + $0x160] sm:$0xff]   ;;  %v1870_v46 = vld [vmem:[#allocation2 + $0x28] sm:$0x1]  ;;  %v4429_v55 = vld [vmem:[#allocation2 + $0xb0] sm:$0xff]  ;;  %v1440_v10 = vrot.slane %v1438_v52, 7  ;;  %v1477_v38 = vshll.u32 %v4410_v43, 16 }
 0x13d   : > { %3657 = vmatprep.subr.bf16.mxu1 %v4007_v12  ;;  %v650_v45 = vld [vmem:[#allocation2] sm:$0x80]  ;;  %v4027_v49 = vld [vmem:[%s4853_s3 + $0x168] sm:$0xff]   ;;  %v1893_v56 = vshll.u32 %v1870_v46, 16  ;;  %v652_v57 = vld [vmem:[#allocation2 + $0x18] sm:$0x80] }
 0x13e   : > { %v667_v53 = vshrl.u32 %v650_v45, 16  ;;  %v4028_v59 = vld [vmem:[%s4853_s3 + $0x30] sm:$0xff]   ;;  %v1872_v61 = vld [vmem:[#allocation2 + $0x40] sm:$0x1]  ;;  %v4441_v0 = vld [vmem:[#allocation2 + $0xc8] sm:$0xff]  ;;  %v679_v3 = vshrl.u32 %v652_v57, 16  ;;  %v4511_v57 = vor.u32 %v1441_v58, %v1440_v10 }
 0x13f   : > { %3530 = vmatpush3.bf16.msra.mxu0 %v4006_v11  ;;  %v4029_v63 = vld [vmem:[%s4853_s3 + $0x170] sm:$0xff]   ;;  %v1895_v60 = vrot.slane %v1893_v56, 1  ;;  %v1905_v5 = vshll.u32 %v1872_v61, 16  ;;  %v4030_v8 = vld [vmem:[%s4853_s3 + $0x38] sm:$0xff]   ;;  %v1462_v11 = vshrl.u32 %v4394_v34, 16 }
 0x140   : > { %3658 = vmatpush3.bf16.msra.mxu1 %v4007_v12  ;;  %3531 = vmatprep.subr.bf16.mxu0 %v4008_v13  ;;  %v669_v1 = vrot.slane %v667_v53, 7  ;;  %v654_v6 = vld [vmem:[#allocation2 + $0x30] sm:$0x80]  ;;  %v1874_v9 = vld [vmem:[#allocation2 + $0x58] sm:$0x1] }
 0x141   : > { %3659 = vmatprep.subr.bf16.mxu1 %v4009_v14  ;;  %v4031_v12 = vld [vmem:[%s4853_s3 + $0x178] sm:$0xff]   ;;  %v1464_v47 = vrot.slane %v1462_v11, 7  ;;  %v1878_v50 = vld [vmem:[#allocation2 + $0x88] sm:$0x1] }
 0x142   : > { %v4046_v16 = vld [vmem:[%s4853_s3 + $0xb8] sm:$0xff]  }
 0x143   : > { %3532 = vmatpush3.bf16.msra.mxu0 %v4008_v13  ;;  %v1914_v13 = vrot.slane %v1441_v58, 1  ;;  %v1880_v58 = vld [vmem:[#allocation2 + $0xa0] sm:$0x1] }
 0x144   : > { %3660 = vmatpush3.bf16.msra.mxu1 %v4009_v14  ;;  %3533 = vmatprep.subr.bf16.mxu0 %v4010_v15  ;;  %v677_v14 = vsel %vm603_vm4, %v669_v1, %v676_v2  ;;  %v1941_v1 = vshll.u32 %v1878_v50, 16  ;;  %v660_v2 = vld [vmem:[#allocation2 + $0x78] sm:$0x80] }
 0x145   : > { %3661 = vmatprep.subr.bf16.mxu1 %v4011_v18 }
 0x147   : > { %3534 = vmatpush3.bf16.msra.mxu0 %v4010_v15  ;;  %v681_v15 = vrot.slane %v679_v3, 7 }
 0x148   : > { %3662 = vmatpush3.bf16.msra.mxu1 %v4011_v18  ;;  %3535 = vmatprep.subr.bf16.mxu0 %v4012_v19  ;;  %v4032_v18 = vld [vmem:[%s4853_s3 + $0x80] sm:$0xff]  }
 0x149   : > { %3663 = vmatprep.subr.bf16.mxu1 %v4013_v20 }
 0x14b   : > { %3536 = vmatpush3.bf16.msra.mxu0 %v4012_v19  ;;  %v691_v19 = vshrl.u32 %v654_v6, 16  ;;  %v1486_v6 = vshrl.u32 %v4429_v55, 16 }
 0x14c   : > { %3664 = vmatpush3.bf16.msra.mxu1 %v4013_v20  ;;  %3537 = vmatprep.subr.bf16.mxu0 %v4014_v21  ;;  %v656_v20 = vld [vmem:[#allocation2 + $0x48] sm:$0x80] }
 0x14d   : > { %3665 = vmatprep.subr.bf16.mxu1 %v4015_v22 }
 0x14f   : > { %3538 = vmatpush3.bf16.msra.mxu0 %v4014_v21  ;;  %v4466_v21 = vor.u32 %v1417_v39, %v1416_v48  ;;  %v693_v39 = vrot.slane %v691_v19, 7  ;;  %v1943_v19 = vrot.slane %v1941_v1, 1 }
 0x150   : > { %3666 = vmatpush3.bf16.msra.mxu1 %v4015_v22  ;;  %3555 = vmatprep.subr.bf16.mxu0 %v4016_v23  ;;  %v1896_v22 = vsel %vm1109_vm6, %v4445_v4, %v1895_v60  ;;  %v662_v60 = vld [vmem:[#allocation2 + $0x90] sm:$0x80] }
 0x151   : > { %3683 = vmatprep.subr.bf16.mxu1 %v4017_v24 }
 0x152   : > { %3540 = vmatmul.mubr.bf16.vlgmr.msra.gmra.mrb[20].mxu0 %v4339_v17  ;;  %v4477_v17 = vor.u32 %v1429_v42, %v1428_v51  ;;  %v689_v42 = vsel %vm603_vm4, %v681_v15, %v4466_v21  ;;  %v4035_v51 = vld [vmem:[%s4853_s3 + $0x188] sm:$0xff]  }
 0x153   : > { %3668 = vmatmul.mubr.bf16.vlgmr.msra.gmra.mrb[0].mxu1 %v4364_v25  ;;  %3556 = vmatpush3.bf16.msra.mxu0 %v4016_v23  ;;  %v1907_v23 = vrot.slane %v1905_v5, 1  ;;  %v1882_v5 = vld [vmem:[#allocation2 + $0xb8] sm:$0x1] }
 0x154   : > { %3684 = vmatpush3.bf16.msra.mxu1 %v4017_v24  ;;  %3557 = vmatprep.subr.bf16.mxu0 %v4018_v26  ;;  %v1917_v24 = vshll.u32 %v1874_v9, 16  ;;  %v701_v56 = vsel %vm603_vm4, %v693_v39, %v4477_v17  ;;  %v4037_v9 = vld [vmem:[%s4853_s3 + $0x190] sm:$0xff]   ;;  %v1488_v39 = vrot.slane %v1486_v6, 7 }
 0x155   : > { %3685 = vmatprep.subr.bf16.mxu1 %v4019_v27  ;;  %3543 = vmatprep.mubr.bf16.mxu0 %v4364_v25 }
 0x156   : > { %3671 = vmatprep.mubr.bf16.mxu1 %v4374_v28  ;;  %v1919_v45 = vrot.slane %v1917_v24, 1 }
 0x157   : > { %3558 = vmatpush3.bf16.msra.mxu0 %v4018_v26  ;;  %v4473_v26 = vor.u32 %v1902_v54, %v1426_v41  ;;  %v658_v41 = vld [vmem:[#allocation2 + $0x60] sm:$0x80] }
 0x158   : > { %3686 = vmatpush3.bf16.msra.mxu1 %v4019_v27  ;;  %3559 = vmatprep.subr.bf16.mxu0 %v4020_v29  ;;  %v1876_v27 = vld [vmem:[#allocation2 + $0x70] sm:$0x1]  ;;  %v715_v53 = vshrl.u32 %v658_v41, 16 }
 0x159   : > { %3687 = vmatprep.subr.bf16.mxu1 %v4021_v30  ;;  %v1929_v46 = vshll.u32 %v1876_v27, 16  ;;  %v1908_v48 = vsel %vm1109_vm6, %v4473_v26, %v1907_v23  ;;  %v1965_v23 = vshll.u32 %v1882_v5, 16  ;;  %v664_v27 = vld [vmem:[#allocation2 + $0xa8] sm:$0x80] }
 0x15a   : > { %3544 = vmatmul.mubr.bf16.gmra.mrb[24].mxu0 %v4374_v28 }
 0x15b   : > { %3672 = vmatmul.mubr.bf16.gmra.mrb[4].mxu1 %v4384_v31  ;;  %3560 = vmatpush3.bf16.msra.mxu0 %v4020_v29  ;;  %v1452_v29 = vrot.slane %v1450_v62, 7  ;;  %v1967_v50 = vrot.slane %v1965_v23, 1 }
 0x15c   : > { %3688 = vmatpush3.bf16.msra.mxu1 %v4021_v30  ;;  %3561 = vmatprep.subr.bf16.mxu0 %v4022_v32  ;;  %v1465_v30 = vshll.u32 %v4394_v34, 16 }
 0x15d   : > { %3689 = vmatprep.subr.bf16.mxu1 %v4023_v33  ;;  %3547 = vmatprep.mubr.bf16.mxu0 %v4384_v31  ;;  %v4529_v10 = vor.u32 %v1453_v7, %v1452_v29  ;;  %v1501_v29 = vshll.u32 %v4441_v0, 16 }
 0x15e   : > { %3675 = vmatprep.mubr.bf16.mxu1 %v4394_v34  ;;  %v1938_v54 = vrot.slane %v1465_v30, 1 }
 0x15f   : > { %3562 = vmatpush3.bf16.msra.mxu0 %v4022_v32  ;;  %v4033_v32 = vld [vmem:[%s4853_s3 + $0x180] sm:$0xff]  }
 0x160   : > { %3690 = vmatpush3.bf16.msra.mxu1 %v4023_v33  ;;  %3563 = vmatprep.subr.bf16.mxu0 %v4024_v36  ;;  %v703_v33 = vshrl.u32 %v656_v20, 16  ;;  %v4540_v15 = vor.u32 %v1938_v54, %v1462_v11  ;;  %v1953_v20 = vshll.u32 %v1880_v58, 16  ;;  %v1115_v58 = vrot.slane %v674_v37, 1  ;;  %v4044_v37 = vld [vmem:[%s4853_s3 + $0xb0] sm:$0xff]  }
 0x161   : > { %3691 = vmatprep.subr.bf16.mxu1 %v4025_v40 }
 0x162   : > { %3548 = vmatmul.mubr.bf16.gmra.mrb[28].mxu0 %v4394_v34 }
 0x163   : > { %3676 = vmatmul.mubr.bf16.gmra.mrb[8].mxu1 %v4410_v43  ;;  %3564 = vmatpush3.bf16.msra.mxu0 %v4024_v36  ;;  %v1474_v36 = vshrl.u32 %v4410_v43, 16 }
 0x164   : > { %3692 = vmatpush3.bf16.msra.mxu1 %v4025_v40  ;;  %3565 = vmatprep.subr.bf16.mxu0 %v4026_v44  ;;  %v1926_v40 = vrot.slane %v1453_v7, 1  ;;  %v4039_v7 = vld [vmem:[%s4853_s3 + $0x198] sm:$0xff]  }
 0x165   : > { %3693 = vmatprep.subr.bf16.mxu1 %v4027_v49  ;;  %3551 = vmatprep.mubr.bf16.mxu0 %v4410_v43  ;;  %v1476_v11 = vrot.slane %v1474_v36, 7 }
 0x166   : > { %3679 = vmatprep.mubr.bf16.mxu1 %v4429_v55  ;;  %v4520_v3 = vor.u32 %v1926_v40, %v1450_v62  ;;  %v1950_v62 = vrot.slane %v1477_v38, 1  ;;  %v1944_v40 = vsel %vm1109_vm6, %v4540_v15, %v1943_v19  ;;  %v2170_v19 = vld [vmem:[#allocation2 + $0x48] sm:$0x80] }
 0x167   : > { %3566 = vmatpush3.bf16.msra.mxu0 %v4026_v44  ;;  %v4493_v44 = vor.u32 %v1914_v13, %v1438_v52  ;;  %v705_v52 = vrot.slane %v703_v33, 7  ;;  %v4038_v13 = vld [vmem:[%s4853_s3 + $0x98] sm:$0xff]   ;;  %v4554_v33 = vor.u32 %v1465_v30, %v1464_v47  ;;  %v4041_v47 = vld [vmem:[%s4853_s3 + $0x1a0] sm:$0xff]  }
 0x168   : > { %3694 = vmatpush3.bf16.msra.mxu1 %v4027_v49  ;;  %3567 = vmatprep.subr.bf16.mxu0 %v4028_v59  ;;  %v4034_v49 = vld [vmem:[%s4853_s3 + $0x88] sm:$0xff]   ;;  %v4565_v30 = vor.u32 %v1950_v62, %v1474_v36 }
 0x169   : > { %3695 = vmatprep.subr.bf16.mxu1 %v4029_v63  ;;  %v1920_v61 = vsel %vm1109_vm6, %v4493_v44, %v1919_v45  ;;  %v4040_v45 = vld [vmem:[%s4853_s3 + $0xa0] sm:$0xff]  }
 0x16a   : > { %3552 = vmatmul.mubr.bf16.gmra.mrb[32].mxu0 %v4429_v55 }
 0x16b   : > { %3680 = vmatmul.mubr.bf16.gmra.mrb[12].mxu1 %v4441_v0  ;;  %3568 = vmatpush3.bf16.msra.mxu0 %v4028_v59  ;;  %v4036_v59 = vld [vmem:[%s4853_s3 + $0x90] sm:$0xff]  }
 0x16c   : > { %3696 = vmatpush3.bf16.msra.mxu1 %v4029_v63  ;;  %3569 = vmatprep.subr.bf16.mxu0 %v4030_v8  ;;  %v1931_v63 = vrot.slane %v1929_v46, 1  ;;  %v1955_v46 = vrot.slane %v1953_v20, 1 }
 0x16d   : > { %3697 = vmatprep.subr.bf16.mxu1 %v4031_v12  ;;  %3571 = vmatprep.mubr.bf16.mxu0 %v677_v14  ;;  %v717_v14 = vrot.slane %v715_v53, 7  ;;  %v1094_v53 = vld [vmem:[#allocation2 + $0x10] sm:$0x1] }
 0x16e   : > { %3699 = vmatprep.mubr.bf16.mxu1 %v1896_v22  ;;  %v739_v22 = vshrl.u32 %v662_v60, 16  ;;  %v1932_v24 = vsel %vm1109_vm6, %v4520_v3, %v1931_v63  ;;  %v1974_v63 = vrot.slane %v1501_v29, 1  ;;  %v1118_v5 = vshll.u32 %v1094_v53, 16 }
 0x16f   : > { %3570 = vmatpush3.bf16.msra.mxu0 %v4030_v8  ;;  %v1489_v8 = vshll.u32 %v4429_v55, 16 }
 0x170   : > { %3698 = vmatpush3.bf16.msra.mxu1 %v4031_v12  ;;  %3587 = vmatprep.subr.bf16.mxu0 %v4032_v18  ;;  %v713_v12 = vsel %vm603_vm4, %v705_v52, %v4511_v57  ;;  %v4572_v52 = vor.u32 %v1477_v38, %v1476_v11  ;;  %v4042_v38 = vld [vmem:[%s4853_s3 + $0xa8] sm:$0xff]   ;;  %v1120_v20 = vrot.slane %v1118_v5, 1  ;;  %v2172_v11 = vld [vmem:[#allocation2 + $0x60] sm:$0x80] }
 0x171   : > { %3715 = vmatprep.subr.bf16.mxu1 %v4033_v32 }
 0x172   : > { %3572 = vmatmul.mubr.bf16.vlgmr.msra.gmra.mrb[20].mxu0 %v689_v42  ;;  %v1962_v42 = vrot.slane %v1489_v8, 1 }
 0x173   : > { %3700 = vmatmul.mubr.bf16.vlgmr.msra.gmra.mrb[0].mxu1 %v1908_v48  ;;  %3588 = vmatpush3.bf16.msra.mxu0 %v4032_v18  ;;  %v727_v18 = vshrl.u32 %v660_v2, 16  ;;  %v751_v48 = vshrl.u32 %v664_v27, 16  ;;  %v4043_v2 = vld [vmem:[%s4853_s3 + $0x1a8] sm:$0xff]   ;;  %v1098_v27 = vld [vmem:[#allocation2 + $0x40] sm:$0x1] }
 0x174   : > { %3716 = vmatpush3.bf16.msra.mxu1 %v4033_v32  ;;  %3589 = vmatprep.subr.bf16.mxu0 %v4034_v49  ;;  %v725_v32 = vsel %vm603_vm4, %v717_v14, %v4529_v10  ;;  %v4576_v54 = vor.u32 %v1962_v42, %v1486_v6  ;;  %v2209_v42 = vshrl.u32 %v2172_v11, 16  ;;  %v2180_v11 = vld [vmem:[#allocation2 + $0xc0] sm:$0x80] }
 0x175   : > { %3717 = vmatprep.subr.bf16.mxu1 %v4035_v51  ;;  %3575 = vmatprep.mubr.bf16.mxu0 %v701_v56  ;;  %v729_v41 = vrot.slane %v727_v18, 7  ;;  %v2168_v56 = vld [vmem:[#allocation2 + $0x30] sm:$0x80]  ;;  %v753_v62 = vrot.slane %v751_v48, 7  ;;  %v4048_v48 = vld [vmem:[%s4853_s3 + $0xc0] sm:$0xff]  }
 0x176   : > { %3703 = vmatprep.mubr.bf16.mxu1 %v1920_v61  ;;  %v1956_v61 = vsel %vm1109_vm6, %v4565_v30, %v1955_v46  ;;  %v2185_v6 = vshrl.u32 %v2168_v56, 16 }
 0x177   : > { %3590 = vmatpush3.bf16.msra.mxu0 %v4034_v49  ;;  %v741_v49 = vrot.slane %v739_v22, 7  ;;  %v737_v36 = vsel %vm603_vm4, %v729_v41, %v4554_v33  ;;  %v1142_v41 = vshll.u32 %v1098_v27, 16 }
 0x178   : > { %3718 = vmatpush3.bf16.msra.mxu1 %v4035_v51  ;;  %3591 = vmatprep.subr.bf16.mxu0 %v4036_v59  ;;  %v1884_v51 = vld [vmem:[#allocation2 + $0xd0] sm:$0x1]  ;;  %v2187_v22 = vrot.slane %v2185_v6, 7 }
 0x179   : > { %3719 = vmatprep.subr.bf16.mxu1 %v4037_v9  ;;  %v1977_v1 = vshll.u32 %v1884_v51, 16  ;;  %v749_v60 = vsel %vm603_vm4, %v741_v49, %v4572_v52  ;;  %v2174_v51 = vld [vmem:[#allocation2 + $0x78] sm:$0x80]  ;;  %v1144_v53 = vrot.slane %v1142_v41, 1 }
 0x17a   : > { %3576 = vmatmul.mubr.bf16.gmra.mrb[24].mxu0 %v713_v12  ;;  %v4597_v12 = vor.u32 %v1489_v8, %v1488_v39  ;;  %v1116_v8 = vor.u32 %v1115_v58, %v671_v35  ;;  %v2197_v35 = vshrl.u32 %v2170_v19, 16  ;;  %v4047_v39 = vld [vmem:[%s4853_s3 + $0x1b8] sm:$0xff]   ;;  %v2176_v58 = vld [vmem:[#allocation2 + $0x90] sm:$0x80] }
 0x17b   : > { %3704 = vmatmul.mubr.bf16.gmra.mrb[4].mxu1 %v1932_v24  ;;  %3592 = vmatpush3.bf16.msra.mxu0 %v4036_v59  ;;  %v1498_v59 = vshrl.u32 %v4441_v0, 16  ;;  %v1979_v18 = vrot.slane %v1977_v1, 1  ;;  %v4050_v1 = vld [vmem:[%s4853_s3 + $0xc8] sm:$0xff]  }
 0x17c   : > { %3720 = vmatpush3.bf16.msra.mxu1 %v4037_v9  ;;  %3593 = vmatprep.subr.bf16.mxu0 %v4038_v13  ;;  %v1968_v9 = vsel %vm1109_vm6, %v4576_v54, %v1967_v50  ;;  %v761_v24 = vsel %vm603_vm4, %v753_v62, %v4597_v12  ;;  %v2199_v49 = vrot.slane %v2197_v35, 7  ;;  %v4049_v50 = vld [vmem:[%s4853_s3 + $0x1c0] sm:$0xff]   ;;  %v2233_v62 = vshrl.u32 %v2176_v58, 16 }
 0x17d   : > { %3721 = vmatprep.subr.bf16.mxu1 %v4039_v7  ;;  %3579 = vmatprep.mubr.bf16.mxu0 %v725_v32  ;;  %v1975_v14 = vor.u32 %v1974_v63, %v1498_v59 }
 0x17e   : > { %3707 = vmatprep.mubr.bf16.mxu1 %v1944_v40  ;;  %v1121_v40 = vsel %vm1109_vm6, %v1116_v8, %v1120_v20  ;;  %v2207_v63 = vsel %vm603_vm4, %v2199_v49, %v4511_v57  ;;  %v2235_v19 = vrot.slane %v2233_v62, 7  ;;  %v1395_v62 = vld [vmem:[#allocation2 + $0x30] sm:$0x80] }
 0x17f   : > { %3594 = vmatpush3.bf16.msra.mxu0 %v4038_v13  ;;  %v1096_v13 = vld [vmem:[#allocation2 + $0x28] sm:$0x1]  ;;  %v1980_v32 = vsel %vm1109_vm6, %v1975_v14, %v1979_v18  ;;  %v2178_v18 = vld [vmem:[#allocation2 + $0xa8] sm:$0x80] }
 0x180   : > { %3722 = vmatpush3.bf16.msra.mxu1 %v4039_v7  ;;  %3595 = vmatprep.subr.bf16.mxu0 %v4040_v45  ;;  %v4045_v7 = vld [vmem:[%s4853_s3 + $0x1b0] sm:$0xff]   ;;  %v1130_v23 = vshll.u32 %v1096_v13, 16  ;;  %v1104_v14 = vld [vmem:[#allocation2 + $0x88] sm:$0x1]  ;;  %v2245_v27 = vshrl.u32 %v2178_v18, 16 }
 0x181   : > { %3723 = vmatprep.subr.bf16.mxu1 %v4041_v47  ;;  %v4052_v13 = vld [vmem:[%s4853_s3 + $0xd0] sm:$0xff]   ;;  %v1178_v20 = vshll.u32 %v1104_v14, 16 }
 0x182   : > { %3580 = vmatmul.mubr.bf16.gmra.mrb[28].mxu0 %v737_v36  ;;  %v1132_v46 = vrot.slane %v1130_v23, 1  ;;  %v2211_v36 = vrot.slane %v2209_v42, 7  ;;  %v2257_v42 = vshrl.u32 %v2180_v11, 16 }
 0x183   : > { %3708 = vmatmul.mubr.bf16.gmra.mrb[8].mxu1 %v1956_v61  ;;  %3596 = vmatpush3.bf16.msra.mxu0 %v4040_v45  ;;  %v2195_v45 = vsel %vm603_vm4, %v2187_v22, %v4477_v17  ;;  %v1106_v22 = vld [vmem:[#allocation2 + $0xa0] sm:$0x1]  ;;  %v1180_v41 = vrot.slane %v1178_v20, 1 }
 0x184   : > { %3724 = vmatpush3.bf16.msra.mxu1 %v4041_v47  ;;  %3597 = vmatprep.subr.bf16.mxu0 %v4042_v38  ;;  %v1100_v47 = vld [vmem:[#allocation2 + $0x58] sm:$0x1]  ;;  %v1133_v61 = vsel %vm1109_vm6, %v4445_v4, %v1132_v46  ;;  %v1145_v4 = vsel %vm1109_vm6, %v4473_v26, %v1144_v53  ;;  %v2219_v6 = vsel %vm603_vm4, %v2211_v36, %v4529_v10  ;;  %v4053_v26 = vld [vmem:[%s4853_s3 + $0x1d0] sm:$0xff]   ;;  %v2247_v46 = vrot.slane %v2245_v27, 7  ;;  %v1401_v27 = vld [vmem:[#allocation2 + $0x78] sm:$0x80] }
 0x185   : > { %3725 = vmatprep.subr.bf16.mxu1 %v4043_v2  ;;  %3583 = vmatprep.mubr.bf16.mxu0 %v749_v60  ;;  %v1154_v56 = vshll.u32 %v1100_v47, 16  ;;  %v4051_v60 = vld [vmem:[%s4853_s3 + $0x1c8] sm:$0xff]   ;;  %v2259_v53 = vrot.slane %v2257_v42, 7 }
 0x186   : > { %3711 = vmatprep.mubr.bf16.mxu1 %v1968_v9 }
 0x187   : > { %3598 = vmatpush3.bf16.msra.mxu0 %v4042_v38  ;;  %v1102_v38 = vld [vmem:[#allocation2 + $0x70] sm:$0x1]  ;;  %v1156_v9 = vrot.slane %v1154_v56, 1  ;;  %v1393_v56 = vld [vmem:[#allocation2 + $0x18] sm:$0x80] }
 0x188   : > { %3726 = vmatpush3.bf16.msra.mxu1 %v4043_v2  ;;  %3599 = vmatprep.subr.bf16.mxu0 %v4044_v37  ;;  %v2221_v2 = vshrl.u32 %v2174_v51, 16  ;;  %v1166_v5 = vshll.u32 %v1102_v38, 16  ;;  %v1181_v51 = vsel %vm1109_vm6, %v4540_v15, %v1180_v41  ;;  %v4058_v38 = vld [vmem:[%s4853_s3 + $0xe8] sm:$0xff]   ;;  %v1410_v58 = vshrl.u32 %v1393_v56, 16 }
 0x189   : > { %3727 = vmatprep.subr.bf16.mxu1 %v4045_v7  ;;  %v1157_v8 = vsel %vm1109_vm6, %v4493_v44, %v1156_v9  ;;  %v4657_v44 = vld [vmem:[#allocation2 + $0xe0] sm:$0xff]  ;;  %v4059_v15 = vld [vmem:[%s4853_s3 + $0x1e8] sm:$0xff]  }
 0x18a   : > { %3584 = vmatmul.mubr.bf16.gmra.mrb[32].mxu0 %v761_v24  ;;  %v4054_v24 = vld [vmem:[%s4853_s3 + $0xd8] sm:$0xff]   ;;  %v2273_v47 = vshrl.u32 %v4657_v44, 16 }
 0x18b   : > { %3712 = vmatmul.mubr.bf16.gmra.mrb[12].mxu1 %v1980_v32  ;;  %3600 = vmatpush3.bf16.msra.mxu0 %v4044_v37  ;;  %v2223_v37 = vrot.slane %v2221_v2, 7  ;;  %v4055_v32 = vld [vmem:[%s4853_s3 + $0x1d8] sm:$0xff]  }
 0x18c   : > { %3728 = vmatpush3.bf16.msra.mxu1 %v4045_v7  ;;  %3601 = vmatprep.subr.bf16.mxu0 %v4046_v16  ;;  %v1168_v7 = vrot.slane %v1166_v5, 1  ;;  %v4060_v5 = vld [vmem:[%s4853_s3 + $0xf0] sm:$0xff]  }
 0x18d   : > { %3729 = vmatprep.subr.bf16.mxu1 %v4047_v39  ;;  %3603 = vmatprep.mubr.bf16.mxu0 %v1121_v40  ;;  %v2231_v23 = vsel %vm603_vm4, %v2223_v37, %v4554_v33  ;;  %v2243_v40 = vsel %vm603_vm4, %v2235_v19, %v4572_v52  ;;  %v1412_v37 = vrot.slane %v1410_v58, 7  ;;  %v4063_v19 = vld [vmem:[%s4853_s3 + $0x1f8] sm:$0xff]  }
 0x18e   : > { %3731 = vmatprep.mubr.bf16.mxu1 %v2195_v45  ;;  %v1169_v35 = vsel %vm1109_vm6, %v4520_v3, %v1168_v7  ;;  %v4056_v45 = vld [vmem:[%s4853_s3 + $0xe0] sm:$0xff]   ;;  %v4062_v7 = vld [vmem:[%s4853_s3 + $0xf8] sm:$0xff]  }
 0x18f   : > { %3602 = vmatpush3.bf16.msra.mxu0 %v4046_v16  ;;  %v1500_v16 = vrot.slane %v1498_v59, 7  ;;  %v1108_v59 = vld [vmem:[#allocation2 + $0xb8] sm:$0x1]  ;;  %v4057_v3 = vld [vmem:[%s4853_s3 + $0x1e0] sm:$0xff]   ;;  %v1420_v20 = vsel %vm603_vm4, %v1412_v37, %v4466_v21 }
 0x190   : > { %3730 = vmatpush3.bf16.msra.mxu1 %v4047_v39  ;;  %3619 = vmatprep.subr.bf16.mxu0 %v4048_v48  ;;  %v1190_v39 = vshll.u32 %v1106_v22, 16  ;;  %v1202_v36 = vshll.u32 %v1108_v59, 16  ;;  %v2647_v58 = vld [vmem:[#allocation2 + $0x58] sm:$0x1] }
 0x191   : > { %3747 = vmatprep.subr.bf16.mxu1 %v4049_v50 }
 0x192   : > { %3604 = vmatmul.mubr.bf16.vlgmr.msra.gmra.mrb[20].mxu0 %v1133_v61  ;;  %v1192_v49 = vrot.slane %v1190_v39, 1  ;;  %v2255_v61 = vsel %vm603_vm4, %v2247_v46, %v4597_v12  ;;  %v1403_v39 = vld [vmem:[#allocation2 + $0x90] sm:$0x80]  ;;  %v2644_v46 = vld [vmem:[#allocation2 + $0x38] sm:$0xff] }
 0x193   : > { %3732 = vmatmul.mubr.bf16.vlgmr.msra.gmra.mrb[0].mxu1 %v2207_v63  ;;  %3620 = vmatpush3.bf16.msra.mxu0 %v4048_v48  ;;  %v2182_v48 = vld [vmem:[#allocation2 + $0xd8] sm:$0x80]  ;;  %v1470_v42 = vshrl.u32 %v1403_v39, 16 }
 0x194   : > { %3748 = vmatpush3.bf16.msra.mxu1 %v4049_v50  ;;  %3621 = vmatprep.subr.bf16.mxu0 %v4050_v1  ;;  %v4674_v50 = vor.u32 %v1501_v29, %v1500_v16  ;;  %v2269_v63 = vshrl.u32 %v2182_v48, 16  ;;  %v2275_v29 = vrot.slane %v2273_v47, 7  ;;  %v1193_v2 = vsel %vm1109_vm6, %v4565_v30, %v1192_v49  ;;  %v4061_v30 = vld [vmem:[%s4853_s3 + $0x1f0] sm:$0xff]   ;;  %v2645_v49 = vld [vmem:[#allocation2 + $0x40] sm:$0x1] }
 0x195   : > { %3749 = vmatprep.subr.bf16.mxu1 %v4051_v60  ;;  %3607 = vmatprep.mubr.bf16.mxu0 %v1145_v4  ;;  %v1204_v4 = vrot.slane %v1202_v36, 1  ;;  %v1458_v16 = vshrl.u32 %v1401_v27, 16  ;;  %v1472_v59 = vrot.slane %v1470_v42, 7  ;;  %v2663_v48 = vshll.u32 %v2644_v46, 16 }
 0x196   : > { %3735 = vmatprep.mubr.bf16.mxu1 %v2219_v6  ;;  %v2271_v6 = vrot.slane %v2269_v63, 7  ;;  %v2661_v36 = vshrl.u32 %v2644_v46, 16  ;;  %v2648_v63 = vld [vmem:[#allocation2 + $0x68] sm:$0xff] }
 0x197   : > { %3622 = vmatpush3.bf16.msra.mxu0 %v4050_v1  ;;  %v2276_v1 = vshll.u32 %v4657_v44, 16  ;;  %v1205_v14 = vsel %vm1109_vm6, %v4576_v54, %v1204_v4  ;;  %v2665_v56 = vrot.slane %v2663_v48, 1  ;;  %v2649_v4 = vld [vmem:[#allocation2 + $0x70] sm:$0x1] }
 0x198   : > { %3750 = vmatpush3.bf16.msra.mxu1 %v4051_v60  ;;  %3623 = vmatprep.subr.bf16.mxu0 %v4052_v13  ;;  %v2267_v60 = vsel %vm603_vm4, %v2259_v53, %v4674_v50  ;;  %v2692_v37 = vshll.u32 %v2649_v4, 16 }
 0x199   : > { %3751 = vmatprep.subr.bf16.mxu1 %v4053_v26  ;;  %v2278_v9 = vor.u32 %v2276_v1, %v2275_v29 }
 0x19a   : > { %3608 = vmatmul.mubr.bf16.gmra.mrb[24].mxu0 %v1157_v8 }
 0x19b   : > { %3736 = vmatmul.mubr.bf16.gmra.mrb[4].mxu1 %v2231_v23  ;;  %3624 = vmatpush3.bf16.msra.mxu0 %v4052_v13  ;;  %v1397_v13 = vld [vmem:[#allocation2 + $0x48] sm:$0x80]  ;;  %v2279_v18 = vsel %vm603_vm4, %v2271_v6, %v2278_v9  ;;  %v1399_v23 = vld [vmem:[#allocation2 + $0x60] sm:$0x80]  ;;  %v2680_v9 = vshll.u32 %v2647_v58, 16 }
 0x19c   : > { %3752 = vmatpush3.bf16.msra.mxu1 %v4053_v26  ;;  %3625 = vmatprep.subr.bf16.mxu0 %v4054_v24  ;;  %v1422_v26 = vshrl.u32 %v1395_v62, 16  ;;  %v1434_v8 = vshrl.u32 %v1397_v13, 16  ;;  %v1446_v11 = vshrl.u32 %v1399_v23, 16 }
 0x19d   : > { %3753 = vmatprep.subr.bf16.mxu1 %v4055_v32  ;;  %3611 = vmatprep.mubr.bf16.mxu0 %v1169_v35  ;;  %v4065_v35 = vld [vmem:[%s4853_s3 + $0x208] sm:$0xff]  }
 0x19e   : > { %3739 = vmatprep.mubr.bf16.mxu1 %v2243_v40  ;;  %v1424_v54 = vrot.slane %v1422_v26, 7  ;;  %v1436_v22 = vrot.slane %v1434_v8, 7  ;;  %v1405_v40 = vld [vmem:[#allocation2 + $0xa8] sm:$0x80]  ;;  %v2652_v26 = vld [vmem:[#allocation2 + $0x98] sm:$0xff] }
 0x19f   : > { %3626 = vmatpush3.bf16.msra.mxu0 %v4054_v24  ;;  %v4064_v24 = vld [vmem:[%s4853_s3 + $0x200] sm:$0xff]  }
 0x1a0   : > { %3754 = vmatpush3.bf16.msra.mxu1 %v4055_v32  ;;  %3627 = vmatprep.subr.bf16.mxu0 %v4056_v45  ;;  %v1432_v21 = vsel %vm603_vm4, %v1424_v54, %v4477_v17  ;;  %v1444_v32 = vsel %vm603_vm4, %v1436_v22, %v4511_v57  ;;  %v1460_v17 = vrot.slane %v1458_v16, 7  ;;  %v4066_v57 = vld [vmem:[%s4853_s3 + $0x210] sm:$0xff]   ;;  %v2711_v54 = vshll.u32 %v2652_v26, 16  ;;  %v2653_v22 = vld [vmem:[#allocation2 + $0xa0] sm:$0x1] }
 0x1a1   : > { %3755 = vmatprep.subr.bf16.mxu1 %v4057_v3 }
 0x1a2   : > { %3612 = vmatmul.mubr.bf16.gmra.mrb[28].mxu0 %v1181_v51  ;;  %v1480_v51 = vsel %vm603_vm4, %v1472_v59, %v4572_v52  ;;  %v2713_v16 = vrot.slane %v2711_v54, 1 }
 0x1a3   : > { %3740 = vmatmul.mubr.bf16.gmra.mrb[8].mxu1 %v2255_v61  ;;  %3628 = vmatpush3.bf16.msra.mxu0 %v4056_v45  ;;  %v1482_v45 = vshrl.u32 %v1405_v40, 16  ;;  %v2668_v61 = vshll.u32 %v2645_v49, 16 }
 0x1a4   : > { %3756 = vmatpush3.bf16.msra.mxu1 %v4057_v3  ;;  %3629 = vmatprep.subr.bf16.mxu0 %v4058_v38  ;;  %v1407_v3 = vld [vmem:[#allocation2 + $0xc0] sm:$0x80] }
 0x1a5   : > { %3757 = vmatprep.subr.bf16.mxu1 %v4059_v15  ;;  %3615 = vmatprep.mubr.bf16.mxu0 %v1193_v2  ;;  %v1494_v53 = vshrl.u32 %v1407_v3, 16  ;;  %v2670_v2 = vrot.slane %v2668_v61, 1 }
 0x1a6   : > { %3743 = vmatprep.mubr.bf16.mxu1 %v2267_v60  ;;  %v2687_v60 = vshll.u32 %v2648_v63, 16 }
 0x1a7   : > { %3630 = vmatpush3.bf16.msra.mxu0 %v4058_v38  ;;  %v2646_v38 = vld [vmem:[#allocation2 + $0x50] sm:$0xff]  ;;  %v1496_v52 = vrot.slane %v1494_v53, 7 }
 0x1a8   : > { %3758 = vmatpush3.bf16.msra.mxu1 %v4059_v15  ;;  %3631 = vmatprep.subr.bf16.mxu0 %v4060_v5  ;;  %v2675_v29 = vshll.u32 %v2646_v38, 16  ;;  %v2666_v15 = vor.u32 %v2665_v56, %v2661_v36  ;;  %v2689_v13 = vrot.slane %v2687_v60, 1  ;;  %v2659_v56 = vld [vmem:[#allocation2 + $0xe8] sm:$0x1] }
 0x1a9   : > { %3759 = vmatprep.subr.bf16.mxu1 %v4061_v30 }
 0x1aa   : > { %3616 = vmatmul.mubr.bf16.gmra.mrb[32].mxu0 %v1205_v14  ;;  %v2677_v6 = vrot.slane %v2675_v29, 1  ;;  %v2671_v62 = vsel %vm1109_vm6, %v2666_v15, %v2670_v2  ;;  %v2650_v14 = vld [vmem:[#allocation2 + $0x80] sm:$0xff] }
 0x1ab   : > { %3744 = vmatmul.mubr.bf16.gmra.mrb[12].mxu1 %v2279_v18  ;;  %3632 = vmatpush3.bf16.msra.mxu0 %v4060_v5  ;;  %v1504_v5 = vsel %vm603_vm4, %v1496_v52, %v4674_v50  ;;  %v2682_v18 = vrot.slane %v2680_v9, 1 }
 0x1ac   : > { %3760 = vmatpush3.bf16.msra.mxu1 %v4061_v30  ;;  %3633 = vmatprep.subr.bf16.mxu0 %v4062_v7  ;;  %v2685_v30 = vshrl.u32 %v2648_v63, 16  ;;  %v2752_v63 = vshll.u32 %v2659_v56, 16 }
 0x1ad   : > { %3761 = vmatprep.subr.bf16.mxu1 %v4063_v19  ;;  %3635 = vmatprep.mubr.bf16.mxu0 %v1420_v20  ;;  %v2651_v20 = vld [vmem:[#allocation2 + $0x88] sm:$0x1] }
 0x1ae   : > { %3763 = vmatprep.mubr.bf16.mxu1 %v4364_v25  ;;  %v1448_v25 = vrot.slane %v1446_v11, 7  ;;  %v2690_v8 = vor.u32 %v2689_v13, %v2685_v30 }
 0x1af   : > { %3634 = vmatpush3.bf16.msra.mxu0 %v4062_v7  ;;  %v2699_v7 = vshll.u32 %v2650_v14, 16 }
 0x1b0   : > { %3762 = vmatpush3.bf16.msra.mxu1 %v4063_v19  ;;  %v1456_v41 = vsel %vm603_vm4, %v1448_v25, %v4529_v10  ;;  %v1484_v10 = vrot.slane %v1482_v45, 7  ;;  %v2694_v19 = vrot.slane %v2692_v37, 1  ;;  %v2654_v25 = vld [vmem:[#allocation2 + $0xb0] sm:$0xff] }
 0x1b1   : > { %3779 = vmatprep.subr.bf16.mxu1 %v4064_v24  ;;  %v2701_v27 = vrot.slane %v2699_v7, 1  ;;  %v2723_v40 = vshll.u32 %v2654_v25, 16  ;;  %v2721_v59 = vshrl.u32 %v2654_v25, 16 }
 0x1b2   : > { %3636 = vmatmul.mubr.bf16.vlgmr.msra.gmra.mrb[20].mxu0 %v1432_v21  ;;  %v2704_v21 = vshll.u32 %v2651_v20, 16  ;;  %v2695_v11 = vsel %vm1109_vm6, %v2690_v8, %v2694_v19 }
 0x1b3   : > { %3764 = vmatmul.mubr.bf16.vlgmr.msra.gmra.mrb[0].mxu1 %v4374_v28  ;;  %3639 = vmatprep.mubr.bf16.mxu0 %v1444_v32  ;;  %v1468_v28 = vsel %vm603_vm4, %v1460_v17, %v4554_v33  ;;  %v4068_v33 = vld [vmem:[%s4853_s3 + $0x220] sm:$0xff]   ;;  %v2709_v32 = vshrl.u32 %v2652_v26, 16  ;;  %v2656_v17 = vld [vmem:[#allocation2 + $0xc8] sm:$0xff] }
 0x1b4   : > { %3780 = vmatpush3.bf16.msra.mxu1 %v4064_v24  ;;  %3767 = vmatprep.mubr.bf16.mxu1 %v4384_v31  ;;  %v4067_v31 = vld [vmem:[%s4853_s3 + $0x218] sm:$0xff]   ;;  %v2697_v24 = vshrl.u32 %v2650_v14, 16  ;;  %v2735_v45 = vshll.u32 %v2656_v17, 16  ;;  %v2733_v48 = vshrl.u32 %v2656_v17, 16  ;;  %v4781_v26 = vld [vmem:[%s4854_s4] ss:$0 sm:$0xff] }
 0x1b5   : > { %3781 = vmatprep.subr.bf16.mxu1 %v4065_v35 }
 0x1b6   : > { %v2702_v39 = vor.u32 %v2701_v27, %v2697_v24  ;;  %v2737_v49 = vrot.slane %v2735_v45, 1 }
 0x1b8   : > { %3782 = vmatpush3.bf16.msra.mxu1 %v4065_v35  ;;  %v2716_v35 = vshll.u32 %v2653_v22, 16 }
 0x1b9   : > { %3783 = vmatprep.subr.bf16.mxu1 %v4066_v57 }
 0x1ba   : > { %3640 = vmatmul.mubr.bf16.gmra.mrb[24].mxu0 %v1456_v41  ;;  %v2714_v41 = vor.u32 %v2713_v16, %v2709_v32  ;;  %v2718_v42 = vrot.slane %v2716_v35, 1 }
 0x1bb   : > { %3768 = vmatmul.mubr.bf16.gmra.mrb[4].mxu1 %v4394_v34  ;;  %3643 = vmatprep.mubr.bf16.mxu0 %v1468_v28  ;;  %v1492_v34 = vsel %vm603_vm4, %v1484_v10, %v4597_v12  ;;  %v4070_v12 = vld [vmem:[%s4853_s3 + $0x230] sm:$0xff]   ;;  %v2655_v28 = vld [vmem:[#allocation2 + $0xb8] sm:$0x1]  ;;  %v2725_v10 = vrot.slane %v2723_v40, 1 }
 0x1bc   : > { %3784 = vmatpush3.bf16.msra.mxu1 %v4066_v57  ;;  %3771 = vmatprep.mubr.bf16.mxu1 %v4410_v43  ;;  %v4069_v43 = vld [vmem:[%s4853_s3 + $0x228] sm:$0xff]   ;;  %v2706_v57 = vrot.slane %v2704_v21, 1  ;;  %v2728_v3 = vshll.u32 %v2655_v28, 16 }
 0x1bd   : > { %3785 = vmatprep.subr.bf16.mxu1 %v4067_v31  ;;  %v2726_v53 = vor.u32 %v2725_v10, %v2721_v59 }
 0x1be   : > { %v2707_v46 = vsel %vm1109_vm6, %v2702_v39, %v2706_v57 }
 0x1c0   : > { %3786 = vmatpush3.bf16.msra.mxu1 %v4067_v31  ;;  %v2657_v31 = vld [vmem:[#allocation2 + $0xd0] sm:$0x1] }
 0x1c1   : > { %3787 = vmatprep.subr.bf16.mxu1 %v4068_v33 }
 0x1c2   : > { %3644 = vmatmul.mubr.bf16.gmra.mrb[28].mxu0 %v1480_v51  ;;  %v2740_v51 = vshll.u32 %v2657_v31, 16 }
 0x1c3   : > { %3772 = vmatmul.mubr.bf16.gmra.mrb[8].mxu1 %v4429_v55  ;;  %3647 = vmatprep.mubr.bf16.mxu0 %v1492_v34  ;;  %v2673_v55 = vshrl.u32 %v2646_v38, 16  ;;  %v2730_v34 = vrot.slane %v2728_v3, 1  ;;  %v2749_v38 = vrot.slane %v2276_v1, 1 }
 0x1c4   : > { %3788 = vmatpush3.bf16.msra.mxu1 %v4068_v33  ;;  %3775 = vmatprep.mubr.bf16.mxu1 %v4441_v0  ;;  %v4071_v0 = vld [vmem:[%s4853_s3 + $0x238] sm:$0xff]   ;;  %v2719_v33 = vsel %vm1109_vm6, %v2714_v41, %v2718_v42  ;;  %v2742_v36 = vrot.slane %v2740_v51, 1 }
 0x1c5   : > { %3789 = vmatprep.subr.bf16.mxu1 %v4069_v43  ;;  %v2678_v50 = vor.u32 %v2677_v6, %v2673_v55  ;;  %v2731_v61 = vsel %vm1109_vm6, %v2726_v53, %v2730_v34  ;;  %v2750_v29 = vor.u32 %v2749_v38, %v2273_v47 }
 0x1c7   : > { %v2683_v23 = vsel %vm1109_vm6, %v2678_v50, %v2682_v18 }
 0x1c8   : > { %3790 = vmatpush3.bf16.msra.mxu1 %v4069_v43  ;;  %v2738_v43 = vor.u32 %v2737_v49, %v2733_v48 }
 0x1c9   : > { %3791 = vmatprep.subr.bf16.mxu1 %v4070_v12 }
 0x1ca   : > { %3648 = vmatmul.mubr.bf16.gmra.mrb[32].mxu0 %v1504_v5  ;;  %v2743_v52 = vsel %vm1109_vm6, %v2738_v43, %v2742_v36 }
 0x1cb   : > { %3776 = vmatmul.mubr.bf16.gmra.mrb[12].mxu1 %v4657_v44 }
 0x1cc   : > { %3792 = vmatpush3.bf16.msra.mxu1 %v4070_v12  ;;  %3795 = vmatprep.mubr.bf16.mxu1 %v2671_v62  ;;  %v2754_v12 = vrot.slane %v2752_v63, 1 }
 0x1cd   : > { %3793 = vmatprep.subr.bf16.mxu1 %v4071_v0 }
 0x1ce   : > { %v2755_v15 = vsel %vm1109_vm6, %v2750_v29, %v2754_v12 }
 0x1d0   : > { %3794 = vmatpush3.bf16.msra.mxu1 %v4071_v0 }
 0x1d3   : > { %3796 = vmatmul.mubr.bf16.vlgmr.msra.gmra.mrb[0].mxu1 %v2683_v23 }
 0x1d4   : > { %3799 = vmatprep.mubr.bf16.mxu1 %v2695_v11 }
 0x1db   : > { %3800 = vmatmul.mubr.bf16.gmra.mrb[4].mxu1 %v2707_v46 }
 0x1dc   : > { %3803 = vmatprep.mubr.bf16.mxu1 %v2719_v33 }
 0x1e3   : > { %3804 = vmatmul.mubr.bf16.gmra.mrb[8].mxu1 %v2731_v61 }
 0x1e4   : > { %3807 = vmatprep.mubr.bf16.mxu1 %v2743_v52 }
 0x1eb   : > { %3808 = vmatmul.mubr.bf16.gmra.mrb[12].mxu1 %v2755_v15 }
 0x285   : > { %v3637_v2 = vpop.f32.mrb[20].mxu0 }
 0x286   : > { %v1612_v58 = vpop.f32.mrb[21].mxu0 }
 0x287   : > { %v3638_v60 = vpop.f32.mrb[22].mxu0 }
 0x288   : > { %v1615_v4 = vpop.f32.mrb[23].mxu0 }
 0x28d   : > { %v3641_v5 = vpop.f32.mrb[24].mxu0 }
 0x28e   : > { %v1628_v55 = vpop.f32.mrb[25].mxu0 }
 0x28f   : > { %v3642_v6 = vpop.f32.mrb[26].mxu0 }
 0x290   : > { %v1631_v1 = vpop.f32.mrb[27].mxu0 }
 0x295   : > { %v3645_v9 = vpop.f32.mrb[28].mxu0 }
 0x296   : > { %v1644_v0 = vpop.f32.mrb[29].mxu0 }
 0x297   : > { %v3646_v62 = vpop.f32.mrb[30].mxu0 }
 0x298   : > { %v1647_v30 = vpop.f32.mrb[31].mxu0 }
 0x29d   : > { %v4770_v13 = vpop.f32.mrb[32].mxu0 }
 0x29e   : > { %v4772_v44 = vpop.f32.mrb[33].mxu0 }
 0x29f   : > { %v4774_v47 = vpop.f32.mrb[34].mxu0 }
 0x2a0   : > { %v4776_v37 = vpop.f32.mrb[35].mxu0 }
 0x2a6   : > { %v3797_v14 = vpop.f32.mrb[0].mxu1 }
 0x2a7   : > { %v3811_v50 = vadd.f32 %v3797_v14, %v3637_v2  ;;  %v2863_v18 = vpop.f32.mrb[1].mxu1 }
 0x2a8   : > { %v3812_v7 = vadd.f32 %v2863_v18, %v1612_v58  ;;  %v3798_v8 = vpop.f32.mrb[2].mxu1 }
 0x2a9   : > { %v2951_v19 = vadd.f32 %v3811_v50, %v4781_v26  ;;  %v3813_v20 = vadd.f32 %v3798_v8, %v3638_v60  ;;  %v2866_v54 = vpop.f32.mrb[3].mxu1 }
 0x2aa   : > { %v2949_v22 = vadd.f32 %v3812_v7, %v4781_v26  ;;  %v3814_v23 = vadd.f32 %v2866_v54, %v1615_v4 }
 0x2ab   : > { %v2967_v24 = vmax.f32 %v2951_v19, 0.0  ;;  %v2952_v27 = vadd.f32 %v3813_v20, %v4781_v26 }
 0x2ac   : > { %v2965_v21 = vmax.f32 %v2949_v22, 0.0  ;;  %v2950_v11 = vadd.f32 %v3814_v23, %v4781_v26 }
 0x2ad   : > { %2984 = vst.msk [vmem:[%s4195_s16 + $0x10] sm:$0xff] %vm2981_vm7, %v2967_v24  ;;  %v2968_v32 = vmax.f32 %v2952_v27, 0.0 }
 0x2ae   : > { %2982 = vst.msk [vmem:[%s4195_s16] sm:$0xff] %vm2981_vm7, %v2965_v21  ;;  %v2966_v16 = vmax.f32 %v2950_v11, 0.0  ;;  %v3801_v35 = vpop.f32.mrb[4].mxu1 }
 0x2af   : > { %2985 = vst.msk [vmem:[%s4195_s16 + $0x18] sm:$0xff] %vm2981_vm7, %v2968_v32  ;;  %v3815_v25 = vadd.f32 %v3801_v35, %v3641_v5  ;;  %v2879_v17 = vpop.f32.mrb[5].mxu1 }
 0x2b0   : > { %2983 = vst.msk [vmem:[%s4195_s16 + $0x8] sm:$0xff] %vm2981_vm7, %v2966_v16  ;;  %v3816_v39 = vadd.f32 %v2879_v17, %v1628_v55  ;;  %v3802_v57 = vpop.f32.mrb[6].mxu1 }
 0x2b1   : > { %v2955_v40 = vadd.f32 %v3815_v25, %v4781_v26  ;;  %v3817_v41 = vadd.f32 %v3802_v57, %v3642_v6  ;;  %v2882_v42 = vpop.f32.mrb[7].mxu1 }
 0x2b2   : > { %v2953_v28 = vadd.f32 %v3816_v39, %v4781_v26  ;;  %v3818_v45 = vadd.f32 %v2882_v42, %v1631_v1 }
 0x2b3   : > { %v2971_v31 = vmax.f32 %v2955_v40, 0.0  ;;  %v2956_v46 = vadd.f32 %v3817_v41, %v4781_v26 }
 0x2b4   : > { %v2969_v59 = vmax.f32 %v2953_v28, 0.0  ;;  %v2954_v10 = vadd.f32 %v3818_v45, %v4781_v26 }
 0x2b5   : > { %2988 = vst.msk [vmem:[%s4195_s16 + $0x30] sm:$0xff] %vm2981_vm7, %v2971_v31  ;;  %v2972_v3 = vmax.f32 %v2956_v46, 0.0 }
 0x2b6   : > { %2986 = vst.msk [vmem:[%s4195_s16 + $0x20] sm:$0xff] %vm2981_vm7, %v2969_v59  ;;  %v2970_v33 = vmax.f32 %v2954_v10, 0.0  ;;  %v3805_v48 = vpop.f32.mrb[8].mxu1 }
 0x2b7   : > { %2989 = vst.msk [vmem:[%s4195_s16 + $0x38] sm:$0xff] %vm2981_vm7, %v2972_v3  ;;  %v3819_v49 = vadd.f32 %v3805_v48, %v3645_v9  ;;  %v2895_v51 = vpop.f32.mrb[9].mxu1 }
 0x2b8   : > { %2987 = vst.msk [vmem:[%s4195_s16 + $0x28] sm:$0xff] %vm2981_vm7, %v2970_v33  ;;  %v3820_v53 = vadd.f32 %v2895_v51, %v1644_v0  ;;  %v3806_v34 = vpop.f32.mrb[10].mxu1 }
 0x2b9   : > { %v2959_v43 = vadd.f32 %v3819_v49, %v4781_v26  ;;  %v3821_v36 = vadd.f32 %v3806_v34, %v3646_v62  ;;  %v2898_v56 = vpop.f32.mrb[11].mxu1 }
 0x2ba   : > { %v2957_v61 = vadd.f32 %v3820_v53, %v4781_v26  ;;  %v3822_v38 = vadd.f32 %v2898_v56, %v1647_v30 }
 0x2bb   : > { %v2975_v63 = vmax.f32 %v2959_v43, 0.0  ;;  %v2960_v52 = vadd.f32 %v3821_v36, %v4781_v26 }
 0x2bc   : > { %v2973_v29 = vmax.f32 %v2957_v61, 0.0  ;;  %v2958_v12 = vadd.f32 %v3822_v38, %v4781_v26 }
 0x2bd   : > { %2992 = vst.msk [vmem:[%s4195_s16 + $0x50] sm:$0xff] %vm2981_vm7, %v2975_v63  ;;  %v2976_v15 = vmax.f32 %v2960_v52, 0.0 }
 0x2be   : > { %2990 = vst.msk [vmem:[%s4195_s16 + $0x40] sm:$0xff] %vm2981_vm7, %v2973_v29  ;;  %v2974_v2 = vmax.f32 %v2958_v12, 0.0  ;;  %v3809_v58 = vpop.f32.mrb[12].mxu1 }
 0x2bf   : > { %2993 = vst.msk [vmem:[%s4195_s16 + $0x58] sm:$0xff] %vm2981_vm7, %v2976_v15  ;;  %v3823_v60 = vadd.f32 %v3809_v58, %v4770_v13  ;;  %v2911_v4 = vpop.f32.mrb[13].mxu1 }
 0x2c0   : > { %2991 = vst.msk [vmem:[%s4195_s16 + $0x48] sm:$0xff] %vm2981_vm7, %v2974_v2  ;;  %v3824_v5 = vadd.f32 %v2911_v4, %v4772_v44  ;;  %v3810_v55 = vpop.f32.mrb[14].mxu1 }
 0x2c1   : > { %v2963_v6 = vadd.f32 %v3823_v60, %v4781_v26  ;;  %v3825_v1 = vadd.f32 %v3810_v55, %v4774_v47  ;;  %v2914_v9 = vpop.f32.mrb[15].mxu1 }
 0x2c2   : > { %v2961_v0 = vadd.f32 %v3824_v5, %v4781_v26  ;;  %v3826_v62 = vadd.f32 %v2914_v9, %v4776_v37 }
 0x2c3   : > { %v2979_v30 = vmax.f32 %v2963_v6, 0.0  ;;  %v2964_v13 = vadd.f32 %v3825_v1, %v4781_v26 }
 0x2c4   : > { %v2977_v14 = vmax.f32 %v2961_v0, 0.0  ;;  %v2962_v50 = vadd.f32 %v3826_v62, %v4781_v26 }
 0x2c5   : > { %2996 = vst.msk [vmem:[%s4195_s16 + $0x70] sm:$0xff] %vm2981_vm7, %v2979_v30  ;;  %v2980_v44 = vmax.f32 %v2964_v13, 0.0 }
 0x2c6   : > { %2994 = vst.msk [vmem:[%s4195_s16 + $0x60] sm:$0xff] %vm2981_vm7, %v2977_v14  ;;  %v2978_v18 = vmax.f32 %v2962_v50, 0.0 }
 0x2c7   : > { %2997 = vst.msk [vmem:[%s4195_s16 + $0x78] sm:$0xff] %vm2981_vm7, %v2980_v44 }
 0x2c8   : > { %2995 = vst.msk [vmem:[%s4195_s16 + $0x68] sm:$0xff] %vm2981_vm7, %v2978_v18 }
 0x2c9 PF: > { %s15_s22 = sadd.s32 1, %s4110_s22   ;;  %s4860_s18 = smov %s4102_s20 }
 0x2ca   : > { %p12_p10 = scmp.ge.s32.totalorder %s15_s22, 6   ;;  %s4861_s19 = smov %s4106_s21 }
 0x2cb   : > { %s4862_s20 = smov %s4865_s23  ;;  %s4863_s21 = smov %s4869_s24 }
 0x2cc   :  { %14 = sbr.rel (!%p12_p10) target bundleno = 3 (0x3), region = 89 }

</bundles_post_ra>
